<compile_context>
chip_gen: v6e
topology: v6e:2x2x1
jax: 0.10.0
libtpu: 0.0.40
codegen_flags: <defaults>
</compile_context>

<pallas_src>
import jax
import jax.numpy as jnp
from jax.experimental import pallas as pl
from jax.experimental.pallas import tpu as pltpu


# ---------------------------------------------------------------------------
# Hardware hints (wrapped defensively; a wrong answer only affects perf).
# ---------------------------------------------------------------------------
def _device_kind() -> str:
    try:
        return jax.devices()[0].device_kind.lower()
    except Exception:
        return ""


def _vmem_capacity_bytes() -> int:
    try:
        return int(pltpu.get_tpu_info().vmem_capacity_bytes)
    except Exception:
        return 64 << 20        # conservative default: v7x per-core VMEM


def _has_bf16_vpu() -> bool:
    # v5e and older have no bf16 VALU/EUP; keep elementwise work in f32 there.
    k = _device_kind()
    return not any(t in k for t in ("v2", "v3", "v4", "v5"))


def _two_tensorcores() -> bool:
    k = _device_kind()
    return ("v7" in k) or ("7x" in k)


def _round_up(x: int, m: int) -> int:
    return ((x + m - 1) // m) * m


# ---------------------------------------------------------------------------
# Tile selection.
# ---------------------------------------------------------------------------
def _choose_tiles(B, N, F, hp_sizes, budget_bytes, act_bytes):
    """Pick (batch_tile, row_tile): the largest tiles whose per-step
    intermediates fit `budget_bytes`.  Accounts for padded hidden widths,
    bf16 matmul copies, the f32 dot outputs and the fused final-layer
    product (review fix: the old estimate under-counted these)."""
    Hmax = max(hp_sizes)
    H1 = hp_sizes[0]
    # live bytes per (batch, i, j) pair inside one grid step
    per_pair = (act_bytes + 10) * Hmax + 16

    def step_bytes(tb, ti):
        rows = tb * ti * N
        resident = tb * N * (4 * H1 + 4 * F)      # a-scratch + resident x block
        return rows * per_pair + resident

    # Small-N regime: block several batch elements with the full row slab.
    tb = B
    while tb > 1 and (B % tb != 0 or step_bytes(tb, N) > budget_bytes):
        tb -= 1
    if step_bytes(tb, N) <= budget_bytes:
        return tb, N

    # Large-N regime: tb = 1, largest row tile (multiple of 8 dividing N).
    best = None
    c = 8
    while c <= N:
        if N % c == 0:
            if step_bytes(1, c) <= budget_bytes:
                best = c
            else:
                break                              # step_bytes monotone in ti
        c += 8
    if best is not None:
        return 1, best

    # Nothing fits the budget: smallest legal tile (review fix: NOT ti = N).
    c = 8
    while c <= N:
        if N % c == 0:
            return 1, c
        c += 8
    return 1, N                                    # N has no multiple-of-8 divisor


def _largest_row_tile_leq(N, limit):
    best = None
    c = 8
    while c <= min(N, limit):
        if N % c == 0:
            best = c
        c += 8
    return best


# ---------------------------------------------------------------------------
# Kernel body.
# ---------------------------------------------------------------------------
def _make_kernel(n_mid, TB, TI, N, H1, act_dtype, h1_dtype, out_mode, cache_a):
    f32 = jnp.float32

    def kernel(*refs):
        x_ref = refs[0]
        if cache_a:
            a_ref, out_ref = refs[-1], refs[-2]
            w_refs = refs[1:-2]
        else:
            out_ref = refs[-1]
            w_refs = refs[1:-1]
        w1a_ref, w1b_ref, b1_ref = w_refs[0], w_refs[1], w_refs[2]
        mid_refs = w_refs[3:3 + 2 * n_mid]
        wl_ref, bl_ref = w_refs[-2], w_refs[-1]

        F = x_ref.shape[-1]
        mat_dtype = w1a_ref.dtype

        # ---- layer 1, j side:  a[b, j, :] = x[b, j] @ W1a + b1  ------------
        def compute_a():
            xf = x_ref[...].reshape(TB * N, F).astype(mat_dtype)
            a_full = jnp.dot(xf, w1a_ref[...], preferred_element_type=f32)
            return (a_full + b1_ref[...]).astype(h1_dtype)

        if cache_a:
            # Row axis is "arbitrary": r == 0 is the first row step of every
            # batch tile, so the cached projection is valid for later steps.
            @pl.when(pl.program_id(1) == 0)
            def _():
                a_ref[...] = compute_a()
            a = a_ref[...]
        else:
            a = compute_a()
        a = a.reshape(TB, 1, N, H1)

        # ---- layer 1, i side:  bm[b, i, :] = x[b, i] @ W1b  (TI rows) ------
        if TI == N:
            x_rows = x_ref[...]
        else:
            start = pl.multiple_of(pl.program_id(1) * TI, TI)
            x_rows = x_ref[:, pl.ds(start, TI), :]
        xr = x_rows.reshape(TB * TI, F).astype(mat_dtype)
        bm = jnp.dot(xr, w1b_ref[...], preferred_element_type=f32)
        bm = bm.astype(h1_dtype).reshape(TB, TI, 1, H1)

        wl = wl_ref[...]                                   # [1, H_last] f32

        if n_mid == 0:
            # Single hidden layer: fuse the 1-wide output weight into the
            # layer-1 ReLU (all f32 elementwise).
            hf = jnp.maximum(a + bm, 0.0) * wl             # [TB,TI,N,H1] f32
        else:
            h = jnp.maximum(a + bm, 0.0)                   # [TB,TI,N,H1] act
            h = h.reshape(TB * TI * N, H1)
            for li in range(n_mid):
                w_ref, b_ref = mid_refs[2 * li], mid_refs[2 * li + 1]
                w = w_ref[...]
                z = jnp.dot(h.astype(w.dtype), w, preferred_element_type=f32)
                if li == n_mid - 1:
                    # fuse the final Linear's weight into the last ReLU
                    hf = jnp.maximum(z + b_ref[...], 0.0) * wl
                else:
                    b = b_ref[...].astype(act_dtype)
                    h = jnp.maximum(z.astype(act_dtype) + b, 0.0)

        # ---- final lane reduction + output bias, lane-dense store ----------
        Hl = hf.shape[-1]
        bl = bl_ref[...]                                   # [1, 1] f32
        if out_mode == "flat":
            out = jnp.sum(hf.reshape(TB, TI * N, Hl), axis=-1) + bl
        elif out_mode == "rows":
            out = jnp.sum(hf.reshape(TB * TI, N, Hl), axis=-1) + bl
        else:  # "cube"
            out = jnp.sum(hf.reshape(TB, TI, N, Hl), axis=-1) + bl
        out_ref[...] = out.astype(out_ref.dtype)

    return kernel


# ---------------------------------------------------------------------------
# Wrapper.
# ---------------------------------------------------------------------------
def edge_concat_adj_net(x, adj, mask, params, *, use_bf16=True,
                        batch_tile=None, row_tile=None):
    """Pallas implementation of EdgeConcatAdjNet.forward.

    x: [B, N, F] f32, adj: [B, N, N] (unused), mask: [B, N] (unused),
    params: list of (W [in, out], b [out]) for each Linear (first in-dim is
    2*F, final out-dim is 1).  Returns adj_new: [B, N, N] f32.

    use_bf16=True (production path) runs the MXU in bf16 with f32
    accumulation; accuracy vs the f32 forward is bounded by bf16 rounding.
    """
    del adj, mask                      # unused by the PyTorch forward as well
    B, N, F = x.shape
    assert len(params) >= 2, "expect at least one hidden layer + output layer"
    w1, b1 = params[0]
    assert w1.shape[0] == 2 * F
    w_last, b_last = params[-1]
    assert w_last.shape[1] == 1

    f32 = jnp.float32
    mat_dtype = jnp.bfloat16 if use_bf16 else f32
    act_dtype = jnp.bfloat16 if (use_bf16 and _has_bf16_vpu()) else f32
    act_bytes = 2 if act_dtype == jnp.bfloat16 else 4

    # ---- host-side weight prep: split W1, zero-pad hidden dims to 128 ------
    hidden = [w.shape[1] for (w, _) in params[:-1]]
    hp = [_round_up(h, 128) for h in hidden]
    n_mid = len(params) - 2
    h1_dtype = f32 if n_mid == 0 else act_dtype

    def pad_to(arr, rows=None, cols=None):
        pr = 0 if rows is None else rows - arr.shape[0]
        pc = 0 if cols is None else cols - arr.shape[1]
        if pr == 0 and pc == 0:
            return arr
        return jnp.pad(arr, ((0, pr), (0, pc)))

    # W1a acts on x[j] (first F features of the concat), W1b on x[i].
    w1a = pad_to(w1[:F], cols=hp[0]).astype(mat_dtype)
    w1b = pad_to(w1[F:], cols=hp[0]).astype(mat_dtype)
    b1r = pad_to(b1.reshape(1, -1), cols=hp[0]).astype(f32)

    flat_weights = [w1a, w1b, b1r]
    for li, (w, b) in enumerate(params[1:-1]):
        flat_weights.append(pad_to(w, rows=hp[li], cols=hp[li + 1]).astype(mat_dtype))
        flat_weights.append(pad_to(b.reshape(1, -1), cols=hp[li + 1]).astype(f32))
    flat_weights.append(pad_to(w_last.reshape(1, -1), cols=hp[-1]).astype(f32))
    flat_weights.append(b_last.reshape(1, 1).astype(f32))

    # ---- per-generation VMEM budget and tile selection ----------------------
    cap = _vmem_capacity_bytes()
    budget = min(32 << 20, cap // 4)                     # ~32 MiB / ~16 MiB (v7x)
    vmem_limit = int(max(32 << 20, min(cap - (8 << 20), (cap * 7) // 8)))

    tb, ti = _choose_tiles(B, N, F, hp, budget, act_bytes)
    if batch_tile is not None:
        tb = batch_tile
    if row_tile is not None:
        ti = row_tile
    assert B % tb == 0 and N % ti == 0, "tiles must divide (B, N)"
    assert ti == N or ti % 8 == 0, "row tile must be a multiple of 8 (or N)"

    two_tc = _two_tensorcores()
    if row_tile is None and two_tc and B // tb == 1 and N // ti == 1:
        # Single-step grid on a 2-TensorCore chip: split the row axis so the
        # second core gets work.
        half = _largest_row_tile_leq(N, N // 2)
        if half is not None:
            ti = half

    n_bs, n_rs = B // tb, N // ti

    # Cache the j-side projection when the batch axis already supplies the
    # parallel steps (or on single-TC chips); otherwise keep the row axis
    # "parallel" so both v7x TensorCores stay busy.
    cache_a = (n_rs > 1) and (n_bs >= 2 or not two_tc)
    dim_sem = ("parallel", "arbitrary") if cache_a else ("parallel", "parallel")

    # ---- output layout: prefer the widest lane-dense store ------------------
    NN = N * N
    if (tb == B or tb % 8 == 0) and (ti == N or (ti * N) % 128 == 0):
        out_mode = "flat"
        out_shape = jax.ShapeDtypeStruct((B, NN), f32)
        out_spec = pl.BlockSpec((tb, ti * N), lambda b, r: (b, r))
    elif tb == 1 and (ti % 8 == 0 or (ti == N and N % 8 == 0)):
        out_mode = "rows"
        n_rt = N // ti
        out_shape = jax.ShapeDtypeStruct((B * N, N), f32)
        out_spec = pl.BlockSpec((ti, N), lambda b, r, _n=n_rt: (b * _n + r, 0))
    else:
        out_mode = "cube"
        out_shape = jax.ShapeDtypeStruct((B, N, N), f32)
        out_spec = pl.BlockSpec((tb, ti, N), lambda b, r: (b, r, 0))

    # Single x input (f32): the "j" slab is resident across row steps and the
    # "i" rows are sliced from it in-kernel (no duplicated DMA stream).
    in_specs = [pl.BlockSpec((tb, N, F), lambda b, r: (b, 0, 0))]
    for w in flat_weights:
        # TODO(synk): pipeline_mode=pl.Buffered(1) would single-buffer these
        # constant-index weights and save a little VMEM; omitted for
        # compatibility (weights here are tiny).
        in_specs.append(pl.BlockSpec(w.shape, lambda b, r, _z=(0,) * w.ndim: _z))

    scratch = [pltpu.VMEM((tb * N, hp[0]), h1_dtype)] if cache_a else []

    kernel = _make_kernel(n_mid, tb, ti, N, hp[0], act_dtype, h1_dtype,
                          out_mode, cache_a)

    out = pl.pallas_call(
        kernel,
        out_shape=out_shape,
        grid_spec=pltpu.PrefetchScalarGridSpec(
            num_scalar_prefetch=0,
            grid=(n_bs, n_rs),
            in_specs=in_specs,
            out_specs=out_spec,
            scratch_shapes=scratch,
        ),
        compiler_params=pltpu.CompilerParams(
            dimension_semantics=dim_sem,
            vmem_limit_bytes=vmem_limit,
        ),
    )(x.astype(f32), *flat_weights)

    return out.reshape(B, N, N)


# ---------------------------------------------------------------------------
# Reference + test harness.
# ---------------------------------------------------------------------------
def _init_params(key, num_features_in, hidden_sizes):
    """Deterministic torch.nn.Linear-style init (uniform +-1/sqrt(fan_in))."""
    sizes = [num_features_in * 2] + list(hidden_sizes) + [1]
    params = []
    for i in range(len(sizes) - 1):
        fan_in, fan_out = sizes[i], sizes[i + 1]
        key, kw, kb = jax.random.split(key, 3)
        bound = 1.0 / (fan_in ** 0.5)
        w = jax.random.uniform(kw, (fan_in, fan_out), jnp.float32, -bound, bound)
        b = jax.random.uniform(kb, (fan_out,), jnp.float32, -bound, bound)
        params.append((w, b))
    return params


def _reference_forward(x, params):
    """Pure-JAX reference mirroring the PyTorch forward (ReLU activation)."""
    B, N, F = x.shape
    ep = jnp.concatenate(
        [jnp.broadcast_to(x[:, None, :, :], (B, N, N, F)),   # x[b, j]
         jnp.broadcast_to(x[:, :, None, :], (B, N, N, F))],  # x[b, i]
        axis=-1)
    h = ep
    for i, (w, b) in enumerate(params):
        h = h @ w + b
        if i < len(params) - 1:
            h = jnp.maximum(h, 0.0)
    return h[..., 0]


if __name__ == "__main__":
    B, N, F = 2, 16, 8
    key = jax.random.PRNGKey(0)
    kx, kadj, kp, kp2 = jax.random.split(key, 4)
    x = jax.random.normal(kx, (B, N, F), jnp.float32)
    adj = jax.random.normal(kadj, (B, N, N), jnp.float32)    # unused by forward
    mask = jnp.ones((B, N), jnp.float32)                     # unused by forward

    # --- MLP with hidden sizes [32, 16] (one hidden->hidden layer) ----------
    params = _init_params(kp, F, [32, 16])
    ref = _reference_forward(x, params)

    # 1) f32 MXU path, auto tiles: tight check against the f32 reference.
    out = jax.block_until_ready(
        edge_concat_adj_net(x, adj, mask, params, use_bf16=False))
    assert out.shape == (B, N, N)
    assert jnp.allclose(out, ref, atol=1e-4, rtol=1e-4), "f32 auto-tile mismatch"

    # 2) f32, explicit small tiles: exercises the multi-step grid, the cached
    #    j-side projection scratch, the in-kernel pl.ds row slice and the
    #    (B*N, N) row-slab output path.  Still a tight check.
    out = jax.block_until_ready(
        edge_concat_adj_net(x, adj, mask, params, use_bf16=False,
                            batch_tile=1, row_tile=8))
    assert jnp.allclose(out, ref, atol=1e-4, rtol=1e-4), "f32 tiled mismatch"

    # 3) Production path: bf16 MXU inputs (+ bf16 activations on v6e/v7x).
    out = jax.block_until_ready(edge_concat_adj_net(x, adj, mask, params))
    assert out.shape == (B, N, N)
    assert float(jnp.max(jnp.abs(out - ref))) < 5e-2, "bf16 path mismatch"

    # 4) Single-hidden-layer MLP (n_mid = 0, odd width 24 -> padded to 128):
    #    exercises the fused layer-1 + output-weight path.
    params0 = _init_params(kp2, F, [24])
    ref0 = _reference_forward(x, params0)
    out0 = jax.block_until_ready(
        edge_concat_adj_net(x, adj, mask, params0, use_bf16=False))
    assert jnp.allclose(out0, ref0, atol=1e-4, rtol=1e-4), "n_mid=0 mismatch"

    print("KERNEL_OK")
</pallas_src>

<mosaic_0001>
module attributes {stable_mosaic.version = 11 : i64} {
  func.func @kernel(%arg0: i32, %arg1: i32, %arg2: memref<2x16x8xf32, #tpu.memory_space<vmem>>, %arg3: memref<8x128xf32, #tpu.memory_space<vmem>>, %arg4: memref<8x128xf32, #tpu.memory_space<vmem>>, %arg5: memref<1x128xf32, #tpu.memory_space<vmem>>, %arg6: memref<128x128xf32, #tpu.memory_space<vmem>>, %arg7: memref<1x128xf32, #tpu.memory_space<vmem>>, %arg8: memref<1x128xf32, #tpu.memory_space<vmem>>, %arg9: memref<1x1xf32, #tpu.memory_space<vmem>>, %arg10: memref<2x256xf32, #tpu.memory_space<vmem>>) attributes {dimension_semantics = [#tpu.dimension_semantics<parallel>, #tpu.dimension_semantics<parallel>], iteration_bounds = array<i64: 1, 1>, scalar_prefetch = 0 : i64, scratch_operands = 0 : i64, tpu.core_type = #tpu.core_type<tc>, window_params = [{transform_indices = @transform_0, window_bounds = array<i64: 2, 16, 8>}, {pipeline_mode = #tpu.pipeline_mode<synchronous>, transform_indices = @transform_1, window_bounds = array<i64: 8, 128>}, {pipeline_mode = #tpu.pipeline_mode<synchronous>, transform_indices = @transform_2, window_bounds = array<i64: 8, 128>}, {pipeline_mode = #tpu.pipeline_mode<synchronous>, transform_indices = @transform_3, window_bounds = array<i64: 1, 128>}, {pipeline_mode = #tpu.pipeline_mode<synchronous>, transform_indices = @transform_4, window_bounds = array<i64: 128, 128>}, {pipeline_mode = #tpu.pipeline_mode<synchronous>, transform_indices = @transform_5, window_bounds = array<i64: 1, 128>}, {pipeline_mode = #tpu.pipeline_mode<synchronous>, transform_indices = @transform_6, window_bounds = array<i64: 1, 128>}, {pipeline_mode = #tpu.pipeline_mode<synchronous>, transform_indices = @transform_7, window_bounds = array<i64: 1, 1>}, {transform_indices = @transform_8, window_bounds = array<i64: 2, 256>}]} {
    %c0 = arith.constant 0 : index
    %c0_0 = arith.constant 0 : index
    %c0_1 = arith.constant 0 : index
    %0 = vector.load %arg2[%c0, %c0_0, %c0_1] : memref<2x16x8xf32, #tpu.memory_space<vmem>>, vector<2x16x8xf32>
    %1 = vector.shape_cast %0 : vector<2x16x8xf32> to vector<32x8xf32>
    %c0_2 = arith.constant 0 : index
    %c0_3 = arith.constant 0 : index
    %2 = vector.load %arg3[%c0_2, %c0_3] : memref<8x128xf32, #tpu.memory_space<vmem>>, vector<8x128xf32>
    %cst = arith.constant dense<0.000000e+00> : vector<32x128xf32>
    %3 = tpu.matmul %1, %2, %cst {dimension_numbers = #tpu.dot_dimension_numbers<[1], [0], [0], [1], [0, 0, 1, 1], [], []>} : vector<32x8xf32>, vector<8x128xf32>, vector<32x128xf32> -> vector<32x128xf32>
    %c0_4 = arith.constant 0 : index
    %c0_5 = arith.constant 0 : index
    %4 = vector.load %arg5[%c0_4, %c0_5] : memref<1x128xf32, #tpu.memory_space<vmem>>, vector<1x128xf32>
    %5 = vector.broadcast %4 : vector<1x128xf32> to vector<32x128xf32>
    %6 = arith.addf %3, %5 : vector<32x128xf32>
    %7 = vector.shape_cast %6 : vector<32x128xf32> to vector<2x1x16x128xf32>
    %c0_6 = arith.constant 0 : index
    %c0_7 = arith.constant 0 : index
    %c0_8 = arith.constant 0 : index
    %8 = vector.load %arg2[%c0_6, %c0_7, %c0_8] : memref<2x16x8xf32, #tpu.memory_space<vmem>>, vector<2x16x8xf32>
    %9 = vector.shape_cast %8 : vector<2x16x8xf32> to vector<32x8xf32>
    %c0_9 = arith.constant 0 : index
    %c0_10 = arith.constant 0 : index
    %10 = vector.load %arg4[%c0_9, %c0_10] : memref<8x128xf32, #tpu.memory_space<vmem>>, vector<8x128xf32>
    %cst_11 = arith.constant dense<0.000000e+00> : vector<32x128xf32>
    %11 = tpu.matmul %9, %10, %cst_11 {dimension_numbers = #tpu.dot_dimension_numbers<[1], [0], [0], [1], [0, 0, 1, 1], [], []>} : vector<32x8xf32>, vector<8x128xf32>, vector<32x128xf32> -> vector<32x128xf32>
    %12 = vector.shape_cast %11 : vector<32x128xf32> to vector<2x16x1x128xf32>
    %c0_12 = arith.constant 0 : index
    %c0_13 = arith.constant 0 : index
    %13 = vector.load %arg8[%c0_12, %c0_13] : memref<1x128xf32, #tpu.memory_space<vmem>>, vector<1x128xf32>
    %14 = vector.broadcast %7 : vector<2x1x16x128xf32> to vector<2x16x16x128xf32>
    %15 = vector.broadcast %12 : vector<2x16x1x128xf32> to vector<2x16x16x128xf32>
    %16 = arith.addf %14, %15 : vector<2x16x16x128xf32>
    %cst_14 = arith.constant 0.000000e+00 : f32
    %17 = vector.broadcast %cst_14 : f32 to vector<2x16x16x128xf32>
    %18 = arith.maximumf %16, %17 : vector<2x16x16x128xf32>
    %19 = vector.shape_cast %18 : vector<2x16x16x128xf32> to vector<512x128xf32>
    %c0_15 = arith.constant 0 : index
    %c0_16 = arith.constant 0 : index
    %20 = vector.load %arg6[%c0_15, %c0_16] : memref<128x128xf32, #tpu.memory_space<vmem>>, vector<128x128xf32>
    %cst_17 = arith.constant dense<0.000000e+00> : vector<512x128xf32>
    %21 = tpu.matmul %19, %20, %cst_17 {dimension_numbers = #tpu.dot_dimension_numbers<[1], [0], [0], [1], [0, 0, 1, 1], [], []>} : vector<512x128xf32>, vector<128x128xf32>, vector<512x128xf32> -> vector<512x128xf32>
    %c0_18 = arith.constant 0 : index
    %c0_19 = arith.constant 0 : index
    %22 = vector.load %arg7[%c0_18, %c0_19] : memref<1x128xf32, #tpu.memory_space<vmem>>, vector<1x128xf32>
    %23 = vector.broadcast %22 : vector<1x128xf32> to vector<512x128xf32>
    %24 = arith.addf %21, %23 : vector<512x128xf32>
    %cst_20 = arith.constant 0.000000e+00 : f32
    %25 = vector.broadcast %cst_20 : f32 to vector<512x128xf32>
    %26 = arith.maximumf %24, %25 : vector<512x128xf32>
    %27 = vector.broadcast %13 : vector<1x128xf32> to vector<512x128xf32>
    %28 = arith.mulf %26, %27 : vector<512x128xf32>
    %c0_21 = arith.constant 0 : index
    %c0_22 = arith.constant 0 : index
    %29 = vector.load %arg9[%c0_21, %c0_22] : memref<1x1xf32, #tpu.memory_space<vmem>>, vector<1x1xf32>
    %30 = vector.shape_cast %28 : vector<512x128xf32> to vector<2x256x128xf32>
    %cst_23 = arith.constant dense<0.000000e+00> : vector<2x256xf32>
    %31 = vector.multi_reduction <add>, %30, %cst_23 [2] : vector<2x256x128xf32> to vector<2x256xf32>
    %32 = vector.broadcast %29 : vector<1x1xf32> to vector<2x256xf32>
    %33 = arith.addf %31, %32 : vector<2x256xf32>
    %c0_24 = arith.constant 0 : index
    %c0_25 = arith.constant 0 : index
    %34 = vector.load %arg10[%c0_24, %c0_25] : memref<2x256xf32, #tpu.memory_space<vmem>>, vector<2x256xf32>
    tpu.vector_store %arg10[%c0_24, %c0_25], %33 {strides = array<i32>} : memref<2x256xf32, #tpu.memory_space<vmem>>, vector<2x256xf32>,
    return
  }
  func.func @transform_0(%arg0: i32, %arg1: i32) -> (i32, i32, i32) {
    %c0_i32 = arith.constant 0 : i32
    %c0_i32_0 = arith.constant 0 : i32
    %c0_i32_1 = arith.constant 0 : i32
    return %arg0, %c0_i32, %c0_i32_0 : i32, i32, i32
  }
  func.func @transform_1(%arg0: i32, %arg1: i32) -> (i32, i32) {
    %c0_i32 = arith.constant 0 : i32
    %c0_i32_0 = arith.constant 0 : i32
    %c0_i32_1 = arith.constant 0 : i32
    return %c0_i32, %c0_i32_0 : i32, i32
  }
  func.func @transform_2(%arg0: i32, %arg1: i32) -> (i32, i32) {
    %c0_i32 = arith.constant 0 : i32
    %c0_i32_0 = arith.constant 0 : i32
    %c0_i32_1 = arith.constant 0 : i32
    return %c0_i32, %c0_i32_0 : i32, i32
  }
  func.func @transform_3(%arg0: i32, %arg1: i32) -> (i32, i32) {
    %c0_i32 = arith.constant 0 : i32
    %c0_i32_0 = arith.constant 0 : i32
    %c0_i32_1 = arith.constant 0 : i32
    return %c0_i32, %c0_i32_0 : i32, i32
  }
  func.func @transform_4(%arg0: i32, %arg1: i32) -> (i32, i32) {
    %c0_i32 = arith.constant 0 : i32
    %c0_i32_0 = arith.constant 0 : i32
    %c0_i32_1 = arith.constant 0 : i32
    return %c0_i32, %c0_i32_0 : i32, i32
  }
  func.func @transform_5(%arg0: i32, %arg1: i32) -> (i32, i32) {
    %c0_i32 = arith.constant 0 : i32
    %c0_i32_0 = arith.constant 0 : i32
    %c0_i32_1 = arith.constant 0 : i32
    return %c0_i32, %c0_i32_0 : i32, i32
  }
  func.func @transform_6(%arg0: i32, %arg1: i32) -> (i32, i32) {
    %c0_i32 = arith.constant 0 : i32
    %c0_i32_0 = arith.constant 0 : i32
    %c0_i32_1 = arith.constant 0 : i32
    return %c0_i32, %c0_i32_0 : i32, i32
  }
  func.func @transform_7(%arg0: i32, %arg1: i32) -> (i32, i32) {
    %c0_i32 = arith.constant 0 : i32
    %c0_i32_0 = arith.constant 0 : i32
    %c0_i32_1 = arith.constant 0 : i32
    return %c0_i32, %c0_i32_0 : i32, i32
  }
  func.func @transform_8(%arg0: i32, %arg1: i32) -> (i32, i32) {
    %c0_i32 = arith.constant 0 : i32
    return %arg0, %arg1 : i32, i32
  }
}

</mosaic_0001>

<bundles_post_ra>
// kernel: tpu_custom_call.1
= control target key start
LH: loop header
LB: loop body
LE: loop exit
PB: predicated region body
PF: predicated region fallthrough
CT: control target
= control target key end

     0   :  { %s6982_s0 = inlined_call_operand.vmem [shape: f32[2,16,8], index: 0, kind: input, shape index: {}]   ;;  %s6983_s1 = inlined_call_operand.vmem [shape: f32[8,128], index: 1, kind: input, shape index: {}]   ;;  %s6984_s2 = inlined_call_operand.vmem [shape: f32[8,128], index: 2, kind: input, shape index: {}]   ;;  %s6985_s3 = inlined_call_operand.vmem [shape: f32[1,128], index: 3, kind: input, shape index: {}]   ;;  %s6986_s4 = inlined_call_operand.hbm [shape: f32[128,128], index: 4, kind: input, shape index: {}]   ;;  %s6987_s5 = inlined_call_operand.vmem [shape: f32[1,128], index: 5, kind: input, shape index: {}]   ;;  %s6988_s6 = inlined_call_operand.vmem [shape: f32[1,128], index: 6, kind: input, shape index: {}]   ;;  %s6989_s7 = inlined_call_operand.<no memory space> [shape: f32[1,1], index: 7, kind: input, shape index: {}]   ;;  %s6990_s8 = inlined_call_operand.hbm [shape: f32[2,256], index: 8, kind: output, shape index: {}]  }
   0x1   :  { %v13_v0 = vstv %s6989_s7 }
   0x2   :  { %14 = vst [vmem:[#allocation2] sm:$0x1] %v13_v0 }
   0x3   :  { %15 = vsyncpa [#allocation4], 0 }
   0x4   :  { %16 = vsyncpa [#allocation5], 0  ;;  %s5323_s29 = smov [#allocation3]  }
   0x5   :  { %s30_s30 = sshll.u32 %s5323_s29, 4  ;;  %s31_s30 = int_to_ptr.vmem [resolvable:$true] %s30_s30 }
   0x6   :  { %s5287_s9 = scalar_lea.vmem %s31_s30, 2048  ;;  %p5292_p1 = scmp.lt.s32.totalorder %s31_s30, %s31_s30 }
   0x7   :  { %p5288_p0 = scmp.ne.s32.totalorder %s31_s30, %s5287_s9  ;;  %p5293_p2 = scmp.lt.s32.totalorder %s5287_s9, %s5287_s9 }
   0x9   :  { %p5294_p3 = por %p5293_p2, %p5292_p1 }
   0xb   :  { %p5295_p4 = pnand %p5294_p3, %p5288_p0 }
   0xd   :  { %5298 = shalt.err (!%p5295_p4)
}
   0xe   :  { %s5324_s10 = smov 128   ;;  %s5325_s11 = smov 8  }
   0xf   :  { %36 = dma.hbm_to_vmem [thread:$0]  %s6986_s4, 2048, %s31_s30, [#allocation4], %s5324_s10, %s5324_s10, %s5325_s11  }
  0x10   :  { %5319 = dma.done.wait [#allocation4], 2048  }
  0x11   :  { %5320 = vsyncadd [#allocation4], 4294965248  ;;  %vm58_vm0 = vcmask 64512   ;;  %v156_v1 = vld [vmem:[%s6984_s2] sm:$0xff]  ;;  %v47_v4 = vld [vmem:[%s6982_s0 + $0x8] sm:$0xff]  ;;  %v5326_v24 = vmov 0   ;;  %v6991_v27 = vlaneseq }
  0x12   :  { %v46_v2 = vld [vmem:[%s6982_s0] sm:$0xff]  ;;  %5098 = vmatprep.subr.mxu1 %v156_v1  ;;  %v48_v5 = vld [vmem:[%s6982_s0 + $0x10] sm:$0xff]  ;;  %v49_v7 = vld [vmem:[%s6982_s0 + $0x18] sm:$0xff]  ;;  %5277 = vset.pattern.permute.xlu0 %v5326_v24  ;;  %v5327_v25 = vmov 1966171168   ;;  %vm4622_vm1 = vcmask 130112  }
  0x13   :  { %v50_v3 = vld [vmem:[%s6983_s1] sm:$0xff]  ;;  %5100 = vmatprep.mubr.msk.f32.mxu1 %vm58_vm0, %v46_v2  ;;  %5099 = vmatpush3.msra.mxu1 %v156_v1  ;;  %v745_v8 = vld [vmem:[#allocation3 + $0x70] sm:$0xff]  ;;  %v744_v9 = vld [vmem:[#allocation3 + $0x68] sm:$0xff]  ;;  %v248_v26 = vunpack.c.l.s4 %v5327_v25  ;;  %v5412_v29 = vshrl.u32 %v6991_v27, 7  ;;  %vm4629_vm2 = vcmask 195712   ;;  %vm4636_vm3 = vcmask 261312  }
  0x14   :  { %5090 = vmatprep.subr.mxu0 %v50_v3  ;;  %v746_v6 = vld [vmem:[#allocation3 + $0x78] sm:$0xff]  ;;  %5101 = vmatmul.mubr.msk.f32.vlgmr.msra.gmra.mxu1 %vm58_vm0, %v47_v4  ;;  %v743_v10 = vld [vmem:[#allocation3 + $0x60] sm:$0xff]  ;;  %v741_v12 = vld [vmem:[#allocation3 + $0x50] sm:$0xff]  ;;  %vm4643_vm4 = vcmask 326912   ;;  %vm4650_vm5 = vcmask 392512   ;;  %vm4657_vm6 = vcmask 458112  }
  0x15   :  { %5091 = vmatpush3.msra.mxu0 %v50_v3  ;;  %5092 = vmatprep.mubr.msk.f32.mxu0 %vm58_vm0, %v46_v2  ;;  %v742_v11 = vld [vmem:[#allocation3 + $0x58] sm:$0xff]  ;;  %v740_v13 = vld [vmem:[#allocation3 + $0x48] sm:$0xff]  ;;  %v739_v14 = vld [vmem:[#allocation3 + $0x40] sm:$0xff]  ;;  %v249_v28 = vunpack.c.0.s8 %v248_v26  ;;  %v5424_v38 = vsub.s32 0, %v5412_v29  ;;  %vm4664_vm7 = vcmask 523712   ;;  %vm4671_vm8 = vcmask 589312  }
  0x16   :  { %5103 = vmatprep.mubr.msk.f32.mxu1 %vm58_vm0, %v48_v5  ;;  %5093 = vmatmul.mubr.msk.f32.vlgmr.msra.gmra.mxu0 %vm58_vm0, %v47_v4  ;;  %v738_v15 = vld [vmem:[#allocation3 + $0x38] sm:$0xff]  ;;  %v737_v16 = vld [vmem:[#allocation3 + $0x30] sm:$0xff]  ;;  %v736_v17 = vld [vmem:[#allocation3 + $0x28] sm:$0xff]  ;;  %vm4678_vm9 = vcmask 654912   ;;  %vm4685_vm10 = vcmask 720512   ;;  %vm4692_vm11 = vcmask 786112  }
  0x17   :  { %5106 = vmatprep.subr.mxu0 %v746_v6  ;;  %5095 = vmatprep.mubr.msk.f32.mxu0 %vm58_vm0, %v48_v5  ;;  %v735_v18 = vld [vmem:[#allocation3 + $0x20] sm:$0xff]  ;;  %v734_v19 = vld [vmem:[#allocation3 + $0x18] sm:$0xff]  ;;  %v733_v20 = vld [vmem:[#allocation3 + $0x10] sm:$0xff]  ;;  %v5417_v31 = vsub.s32 %v249_v28, %v5412_v29  ;;  %vm4699_vm12 = vcmask 851712   ;;  %vm4706_vm13 = vcmask 917312   ;;  %vm4713_vm14 = vcmask 982912  }
  0x18   :  { %5107 = vmatpush3.msra.mxu0 %v746_v6  ;;  %5104 = vmatmul.mubr.msk.f32.gmra.mxu1 %vm58_vm0, %v49_v7  ;;  %v732_v21 = vld [vmem:[#allocation3 + $0x8] sm:$0xff]  ;;  %v731_v22 = vld [vmem:[#allocation3] sm:$0xff]  ;;  %v4998_v23 = vld [vmem:[#allocation2] ss:$0 sm:$0xff]  ;;  %vm4720_vm15 = vcmask 1048512  }
  0x19   :  { %5108 = vmatprep.subr.mxu0 %v745_v8  ;;  %5234 = vmatprep.subr.mxu1 %v746_v6  ;;  %v4987_v39 = vld [vmem:[%s6985_s3] ss:$0 sm:$0xff] }
  0x1a   :  { %5109 = vmatpush3.msra.mxu0 %v745_v8  ;;  %5250 = vmatpush3.msra.mxu1 %v746_v6 }
  0x1b   :  { %5096 = vmatmul.mubr.msk.f32.gmra.mxu0 %vm58_vm0, %v49_v7  ;;  %5110 = vmatprep.subr.mxu0 %v744_v9  ;;  %vm4959_vm0 = vcmask 1041409  }
  0x1c   :  { %5111 = vmatpush3.msra.mxu0 %v744_v9  ;;  %5235 = vmatprep.subr.mxu1 %v745_v8 }
  0x1d   :  { %5112 = vmatprep.subr.mxu0 %v743_v10  ;;  %5251 = vmatpush3.msra.mxu1 %v745_v8 }
  0x1e   :  { %5113 = vmatpush3.msra.mxu0 %v743_v10  ;;  %5236 = vmatprep.subr.mxu1 %v744_v9 }
  0x1f   :  { %5114 = vmatprep.subr.mxu0 %v742_v11  ;;  %5252 = vmatpush3.msra.mxu1 %v744_v9 }
  0x20   :  { %5115 = vmatpush3.msra.mxu0 %v742_v11  ;;  %5237 = vmatprep.subr.mxu1 %v743_v10 }
  0x21   :  { %5116 = vmatprep.subr.mxu0 %v741_v12  ;;  %5253 = vmatpush3.msra.mxu1 %v743_v10 }
  0x22   :  { %5117 = vmatpush3.msra.mxu0 %v741_v12  ;;  %5238 = vmatprep.subr.mxu1 %v742_v11 }
  0x23   :  { %5118 = vmatprep.subr.mxu0 %v740_v13  ;;  %5254 = vmatpush3.msra.mxu1 %v742_v11 }
  0x24   :  { %5119 = vmatpush3.msra.mxu0 %v740_v13  ;;  %5239 = vmatprep.subr.mxu1 %v741_v12 }
  0x25   :  { %5120 = vmatprep.subr.mxu0 %v739_v14  ;;  %5255 = vmatpush3.msra.mxu1 %v741_v12 }
  0x26   :  { %5121 = vmatpush3.msra.mxu0 %v739_v14  ;;  %5240 = vmatprep.subr.mxu1 %v740_v13 }
  0x27   :  { %5122 = vmatprep.subr.mxu0 %v738_v15  ;;  %5256 = vmatpush3.msra.mxu1 %v740_v13 }
  0x28   :  { %5123 = vmatpush3.msra.mxu0 %v738_v15  ;;  %5241 = vmatprep.subr.mxu1 %v739_v14 }
  0x29   :  { %5257 = vmatpush3.msra.mxu1 %v739_v14  ;;  %5124 = vmatprep.subr.mxu0 %v737_v16 }
  0x2a   :  { %5242 = vmatprep.subr.mxu1 %v738_v15  ;;  %5125 = vmatpush3.msra.mxu0 %v737_v16 }
  0x2b   :  { %5258 = vmatpush3.msra.mxu1 %v738_v15  ;;  %5126 = vmatprep.subr.mxu0 %v736_v17 }
  0x2c   :  { %5243 = vmatprep.subr.mxu1 %v737_v16  ;;  %5127 = vmatpush3.msra.mxu0 %v736_v17 }
  0x2d   :  { %5259 = vmatpush3.msra.mxu1 %v737_v16  ;;  %5128 = vmatprep.subr.mxu0 %v735_v18 }
  0x2e   :  { %5244 = vmatprep.subr.mxu1 %v736_v17  ;;  %5129 = vmatpush3.msra.mxu0 %v735_v18 }
  0x2f   :  { %5260 = vmatpush3.msra.mxu1 %v736_v17  ;;  %5130 = vmatprep.subr.mxu0 %v734_v19 }
  0x30   :  { %5245 = vmatprep.subr.mxu1 %v735_v18  ;;  %5131 = vmatpush3.msra.mxu0 %v734_v19 }
  0x31   :  { %5261 = vmatpush3.msra.mxu1 %v735_v18  ;;  %5132 = vmatprep.subr.mxu0 %v733_v20 }
  0x32   :  { %5246 = vmatprep.subr.mxu1 %v734_v19  ;;  %5133 = vmatpush3.msra.mxu0 %v733_v20 }
  0x33   :  { %5262 = vmatpush3.msra.mxu1 %v734_v19  ;;  %5134 = vmatprep.subr.mxu0 %v732_v21 }
  0x34   :  { %5247 = vmatprep.subr.mxu1 %v733_v20  ;;  %5135 = vmatpush3.msra.mxu0 %v732_v21 }
  0x35   :  { %5263 = vmatpush3.msra.mxu1 %v733_v20  ;;  %5136 = vmatprep.subr.mxu0 %v731_v22 }
  0x36   :  { %5248 = vmatprep.subr.mxu1 %v732_v21  ;;  %5137 = vmatpush3.msra.mxu0 %v731_v22 }
  0x37   :  { %5264 = vmatpush3.msra.mxu1 %v732_v21  ;;  %5278 = vset.pattern.permute.xlu1 %v5326_v24 }
  0x38   :  { %5249 = vmatprep.subr.mxu1 %v731_v22  ;;  %1408 = vperm.xlu0 %5277, %v4998_v23  }
  0x39   :  { %5265 = vmatpush3.msra.mxu1 %v731_v22 }
  0xd4   :  { %v5414_v30 = vpop.f32.mrf.mxu1 }
  0xd6   :  { %v223_v32 = vpop.f32.mrf.mxu1  ;;  %v5094_v33 = vpop.f32.mrf.mxu0 }
  0xd7   :  { %v253_v34 = vrot.slane %v223_v32, %v5417_v31  ;;  %v246_v40 = vcombine.high %v223_v32, %v223_v32  ;;  %v5431_v46 = vadd.f32 %v5094_v33, %v4987_v39 }
  0xd8   :  { %v5420_v35 = vpop.f32.mrf.mxu1  ;;  %v137_v42 = vpop.f32.mrf.mxu0 }
  0xd9   :  { %v269_v36 = vrot.slane %v253_v34, %v5417_v31  ;;  %v261_v41 = vcombine.high %v253_v34, %v253_v34  ;;  %v260_v47 = vrot.slane %v246_v40, %v5417_v31  ;;  %v5439_v56 = vadd.f32 %v4987_v39, %v137_v42 }
  0xda   :  { %v233_v37 = vpop.f32.mrf.mxu1 }
  0xdb   :  { %v446_v43 = vrot.slane %v269_v36, %v5424_v38  ;;  %v351_v44 = vrot.slane %v233_v37, %v5417_v31  ;;  %v5097_v45 = vpop.f32.mrf.mxu0  ;;  %v283_v48 = vrot.slane %v261_v41, %v5417_v31  ;;  %v344_v51 = vcombine.high %v233_v37, %v233_v37 }
  0xdc   :  { %v291_v52 = vcombine.high %v269_v36, %v269_v36  ;;  %v5437_v54 = vadd.f32 %v5097_v45, %v4987_v39  ;;  %v262_v58 = vcombine.high %v260_v47, %v260_v47  ;;  %v5443_v59 = vrot.slane %v260_v47, %v5417_v31 }
  0xdd   :  { %v359_v49 = vcombine.high %v351_v44, %v351_v44  ;;  %v367_v50 = vrot.slane %v351_v44, %v5417_v31  ;;  %v604_v53 = vadd.f32 %v446_v43, %v5431_v46  ;;  %v147_v55 = vpop.f32.mrf.mxu0  ;;  %v293_v60 = vcombine.high %v283_v48, %v283_v48 }
  0xde   :  { %v358_v62 = vrot.slane %v344_v51, %v5417_v31  ;;  %v5447_v63 = vadd.f32 %v4987_v39, %v147_v55  ;;  %v603_v0 = vadd.f32 %v446_v43, %v5439_v56  ;;  %v450_v1 = vrot.slane %v283_v48, %v5424_v38 }
  0xdf   :  { %v381_v57 = vrot.slane %v359_v49, %v5417_v31  ;;  %v510_v61 = vrot.slane %v367_v50, %v5424_v38  ;;  %v668_v2 = vmax.f32 %v604_v53, 0.0  ;;  %v454_v4 = vrot.slane %v291_v52, %v5424_v38 }
  0xe0   :  { %v389_v6 = vcombine.high %v367_v50, %v367_v50  ;;  %v667_v7 = vmax.f32 %v603_v0, 0.0  ;;  %v605_v8 = vadd.f32 %v450_v1, %v5439_v56  ;;  %v606_v11 = vadd.f32 %v450_v1, %v5431_v46 }
  0xe1   :  { %v636_v3 = vadd.f32 %v510_v61, %v5437_v54  ;;  %v514_v5 = vrot.slane %v381_v57, %v5424_v38  ;;  %v635_v9 = vadd.f32 %v510_v61, %v5447_v63  ;;  %v391_v10 = vcombine.high %v381_v57, %v381_v57 }
  0xe2   :  { %5138 = vmatprep.mubr.f32.mxu0 %v667_v7  ;;  %v669_v14 = vmax.f32 %v605_v8, 0.0  ;;  %v607_v16 = vadd.f32 %v454_v4, %v5439_v56  ;;  %v458_v17 = vrot.slane %v293_v60, %v5424_v38  ;;  %v360_v20 = vcombine.high %v358_v62, %v358_v62 }
  0xe3   :  { %v700_v12 = vmax.f32 %v636_v3, 0.0  ;;  %v637_v13 = vadd.f32 %v514_v5, %v5447_v63  ;;  %v699_v15 = vmax.f32 %v635_v9, 0.0  ;;  %5139 = vmatmul.mubr.f32.vlgmr.msra.gmra.mxu0 %v668_v2  ;;  %v638_v19 = vadd.f32 %v514_v5, %v5437_v54 }
  0xe4   :  { %v374_v21 = vrot.slane %v358_v62, %v5417_v31  ;;  %5141 = vmatprep.mubr.f32.mxu0 %v669_v14  ;;  %v518_v22 = vrot.slane %v389_v6, %v5424_v38  ;;  %v290_v23 = vrot.slane %v262_v58, %v5417_v31  ;;  %v670_v24 = vmax.f32 %v606_v11, 0.0 }
  0xe5   :  { %v701_v18 = vmax.f32 %v637_v13, 0.0  ;;  %5186 = vmatprep.mubr.f32.mxu1 %v699_v15  ;;  %v608_v25 = vadd.f32 %v454_v4, %v5431_v46  ;;  %v522_v26 = vrot.slane %v391_v10, %v5424_v38  ;;  %v671_v28 = vmax.f32 %v607_v16, 0.0 }
  0xe6   :  { %5187 = vmatmul.mubr.f32.vlgmr.msra.gmra.mxu1 %v700_v12  ;;  %v609_v32 = vadd.f32 %v458_v17, %v5439_v56  ;;  %v639_v33 = vadd.f32 %v518_v22, %v5447_v63  ;;  %v462_v34 = vrot.slane %v5443_v59, %v5424_v38  ;;  %v702_v36 = vmax.f32 %v638_v19, 0.0 }
  0xe7   :  { %5189 = vmatprep.mubr.f32.mxu1 %v701_v18  ;;  %5142 = vmatmul.mubr.f32.gmra.mxu0 %v670_v24  ;;  %v640_v37 = vadd.f32 %v518_v22, %v5437_v54  ;;  %v388_v39 = vrot.slane %v360_v20, %v5417_v31  ;;  %v641_v41 = vadd.f32 %v522_v26, %v5447_v63  ;;  %v672_v43 = vmax.f32 %v608_v25, 0.0 }
  0xe8   :  { %5144 = vmatprep.mubr.f32.mxu0 %v671_v28  ;;  %v703_v40 = vmax.f32 %v639_v33, 0.0  ;;  %v526_v42 = vrot.slane %v374_v21, %v5424_v38  ;;  %v610_v44 = vadd.f32 %v458_v17, %v5431_v46  ;;  %v292_v45 = vcombine.high %v5443_v59, %v5443_v59 }
  0xe9   :  { %v673_v47 = vmax.f32 %v609_v32, 0.0  ;;  %v611_v48 = vadd.f32 %v462_v34, %v5439_v56  ;;  %v466_v49 = vrot.slane %v290_v23, %v5424_v38  ;;  %v704_v50 = vmax.f32 %v640_v37, 0.0 }
  0xea   :  { %5190 = vmatmul.mubr.f32.gmra.mxu1 %v702_v36  ;;  %v642_v51 = vadd.f32 %v522_v26, %v5437_v54  ;;  %v390_v52 = vcombine.high %v374_v21, %v374_v21  ;;  %v705_v53 = vmax.f32 %v641_v41, 0.0  ;;  %v643_v55 = vadd.f32 %v526_v42, %v5447_v63 }
  0xeb   :  { %5192 = vmatprep.mubr.f32.mxu1 %v703_v40  ;;  %5145 = vmatmul.mubr.f32.gmra.mxu0 %v672_v43  ;;  %v530_v57 = vrot.slane %v388_v39, %v5424_v38  ;;  %v302_v58 = vrot.slane %v5414_v30, %v5417_v31  ;;  %v674_v59 = vmax.f32 %v610_v44, 0.0  ;;  %v612_v60 = vadd.f32 %v462_v34, %v5431_v46 }
  0xec   :  { %5147 = vmatprep.mubr.f32.mxu0 %v673_v47  ;;  %v675_v61 = vmax.f32 %v611_v48, 0.0  ;;  %v613_v62 = vadd.f32 %v466_v49, %v5439_v56  ;;  %v470_v0 = vrot.slane %v292_v45, %v5424_v38  ;;  %v294_v1 = vcombine.high %v290_v23, %v290_v23 }
  0xed   :  { %v706_v2 = vmax.f32 %v642_v51, 0.0  ;;  %v644_v3 = vadd.f32 %v526_v42, %v5437_v54  ;;  %v707_v4 = vmax.f32 %v643_v55, 0.0  ;;  %v645_v5 = vadd.f32 %v530_v57, %v5447_v63 }
  0xee   :  { %5193 = vmatmul.mubr.f32.gmra.mxu1 %v704_v50  ;;  %v534_v6 = vrot.slane %v390_v52, %v5424_v38  ;;  %v392_v7 = vcombine.high %v388_v39, %v388_v39  ;;  %v310_v8 = vcombine.high %v302_v58, %v302_v58  ;;  %v318_v9 = vrot.slane %v302_v58, %v5417_v31 }
  0xef   :  { %5195 = vmatprep.mubr.f32.mxu1 %v705_v53  ;;  %5148 = vmatmul.mubr.f32.gmra.mxu0 %v674_v59  ;;  %v676_v10 = vmax.f32 %v612_v60, 0.0  ;;  %v614_v11 = vadd.f32 %v466_v49, %v5431_v46  ;;  %v400_v12 = vrot.slane %v5420_v35, %v5417_v31  ;;  %v677_v13 = vmax.f32 %v613_v62, 0.0 }
  0xf0   :  { %5150 = vmatprep.mubr.f32.mxu0 %v675_v61  ;;  %v615_v14 = vadd.f32 %v470_v0, %v5439_v56  ;;  %v474_v15 = vrot.slane %v294_v1, %v5424_v38  ;;  %v708_v16 = vmax.f32 %v644_v3, 0.0  ;;  %v646_v17 = vadd.f32 %v530_v57, %v5437_v54 }
  0xf1   :  { %v709_v18 = vmax.f32 %v645_v5, 0.0  ;;  %v647_v19 = vadd.f32 %v534_v6, %v5447_v63  ;;  %v538_v20 = vrot.slane %v392_v7, %v5424_v38  ;;  %v5500_v21 = vrot.slane %v310_v8, %v5417_v31 }
  0xf2   :  { %5196 = vmatmul.mubr.f32.gmra.mxu1 %v706_v2  ;;  %v478_v22 = vrot.slane %v318_v9, %v5424_v38  ;;  %v678_v23 = vmax.f32 %v614_v11, 0.0  ;;  %v616_v24 = vadd.f32 %v470_v0, %v5431_v46  ;;  %v408_v25 = vcombine.high %v400_v12, %v400_v12 }
  0xf3   :  { %5198 = vmatprep.mubr.f32.mxu1 %v707_v4  ;;  %5151 = vmatmul.mubr.f32.gmra.mxu0 %v676_v10  ;;  %v416_v26 = vrot.slane %v400_v12, %v5417_v31  ;;  %v679_v28 = vmax.f32 %v615_v14, 0.0  ;;  %v617_v32 = vadd.f32 %v474_v15, %v5439_v56  ;;  %v710_v33 = vmax.f32 %v646_v17, 0.0 }
  0xf4   :  { %5153 = vmatprep.mubr.f32.mxu0 %v677_v13  ;;  %v648_v34 = vadd.f32 %v534_v6, %v5437_v54  ;;  %v711_v37 = vmax.f32 %v647_v19, 0.0  ;;  %v649_v39 = vadd.f32 %v538_v20, %v5447_v63  ;;  %v295_v40 = vcombine.high %v5414_v30, %v5414_v30 }
  0xf5   :  { %v542_v36 = vrot.slane %v416_v26, %v5424_v38  ;;  %v340_v41 = vcombine.high %v318_v9, %v318_v9  ;;  %v680_v42 = vmax.f32 %v616_v24, 0.0  ;;  %v618_v43 = vadd.f32 %v474_v15, %v5431_v46 }
  0xf6   :  { %5199 = vmatmul.mubr.f32.gmra.mxu1 %v708_v16  ;;  %v430_v44 = vrot.slane %v408_v25, %v5417_v31  ;;  %v681_v45 = vmax.f32 %v617_v32, 0.0  ;;  %v619_v47 = vadd.f32 %v478_v22, %v5439_v56  ;;  %v482_v48 = vrot.slane %v5500_v21, %v5424_v38 }
  0xf7   :  { %5201 = vmatprep.mubr.f32.mxu1 %v709_v18  ;;  %5154 = vmatmul.mubr.f32.gmra.mxu0 %v678_v23  ;;  %v393_v49 = vcombine.high %v5420_v35, %v5420_v35  ;;  %v712_v50 = vmax.f32 %v648_v34, 0.0  ;;  %v650_v30 = vadd.f32 %v538_v20, %v5437_v54  ;;  %v438_v51 = vcombine.high %v416_v26, %v416_v26 }
  0xf8   :  { %5156 = vmatprep.mubr.f32.mxu0 %v679_v28  ;;  %v713_v52 = vmax.f32 %v649_v39, 0.0  ;;  %v651_v53 = vadd.f32 %v542_v36, %v5447_v63  ;;  %v546_v55 = vrot.slane %v430_v44, %v5424_v38  ;;  %v309_v57 = vrot.slane %v295_v40, %v5417_v31 }
  0xf9   :  { %v682_v58 = vmax.f32 %v618_v43, 0.0  ;;  %v620_v59 = vadd.f32 %v478_v22, %v5431_v46  ;;  %v342_v35 = vcombine.high %v5500_v21, %v5500_v21  ;;  %v683_v60 = vmax.f32 %v619_v47, 0.0 }
  0xfa   :  { %5202 = vmatmul.mubr.f32.gmra.mxu1 %v710_v33  ;;  %v621_v61 = vadd.f32 %v482_v48, %v5439_v56  ;;  %v486_v62 = vrot.slane %v340_v41, %v5424_v38  ;;  %v407_v0 = vrot.slane %v393_v49, %v5417_v31  ;;  %v714_v1 = vmax.f32 %v650_v30, 0.0 }
  0xfb   :  { %5204 = vmatprep.mubr.f32.mxu1 %v711_v37  ;;  %5157 = vmatmul.mubr.f32.gmra.mxu0 %v680_v42  ;;  %v652_v2 = vadd.f32 %v542_v36, %v5437_v54  ;;  %v440_v3 = vcombine.high %v430_v44, %v430_v44  ;;  %v715_v4 = vmax.f32 %v651_v53, 0.0  ;;  %v653_v5 = vadd.f32 %v546_v55, %v5447_v63 }
  0xfc   :  { %5159 = vmatprep.mubr.f32.mxu0 %v681_v45  ;;  %v550_v6 = vrot.slane %v438_v51, %v5424_v38  ;;  %v311_v7 = vcombine.high %v309_v57, %v309_v57  ;;  %v684_v8 = vmax.f32 %v620_v59, 0.0  ;;  %v622_v9 = vadd.f32 %v482_v48, %v5431_v46 }
  0xfd   :  { %v325_v10 = vrot.slane %v309_v57, %v5417_v31  ;;  %v685_v11 = vmax.f32 %v621_v61, 0.0  ;;  %v623_v12 = vadd.f32 %v486_v62, %v5439_v56  ;;  %v490_v13 = vrot.slane %v342_v35, %v5424_v38 }
  0xfe   :  { %5205 = vmatmul.mubr.f32.gmra.mxu1 %v712_v50  ;;  %v716_v14 = vmax.f32 %v652_v2, 0.0  ;;  %v654_v15 = vadd.f32 %v546_v55, %v5437_v54  ;;  %v409_v16 = vcombine.high %v407_v0, %v407_v0  ;;  %v717_v17 = vmax.f32 %v653_v5, 0.0 }
  0xff   :  { %5207 = vmatprep.mubr.f32.mxu1 %v713_v52  ;;  %5160 = vmatmul.mubr.f32.gmra.mxu0 %v682_v58  ;;  %v655_v18 = vadd.f32 %v550_v6, %v5447_v63  ;;  %v554_v19 = vrot.slane %v440_v3, %v5424_v38  ;;  %v339_v20 = vrot.slane %v311_v7, %v5417_v31  ;;  %v686_v21 = vmax.f32 %v622_v9, 0.0 }
 0x100   :  { %5162 = vmatprep.mubr.f32.mxu0 %v683_v60  ;;  %v624_v22 = vadd.f32 %v486_v62, %v5431_v46  ;;  %v423_v23 = vrot.slane %v407_v0, %v5417_v31  ;;  %v687_v24 = vmax.f32 %v623_v12, 0.0  ;;  %v625_v25 = vadd.f32 %v490_v13, %v5439_v56 }
 0x101   :  { %v494_v26 = vrot.slane %v325_v10, %v5424_v38  ;;  %v718_v28 = vmax.f32 %v654_v15, 0.0  ;;  %v656_v32 = vadd.f32 %v550_v6, %v5437_v54  ;;  %v437_v33 = vrot.slane %v409_v16, %v5417_v31 }
 0x102   :  { %5208 = vmatmul.mubr.f32.gmra.mxu1 %v714_v1  ;;  %v719_v34 = vmax.f32 %v655_v18, 0.0  ;;  %v657_v36 = vadd.f32 %v554_v19, %v5447_v63  ;;  %v558_v37 = vrot.slane %v423_v23, %v5424_v38  ;;  %v688_v39 = vmax.f32 %v624_v22, 0.0 }
 0x103   :  { %5210 = vmatprep.mubr.f32.mxu1 %v715_v4  ;;  %5163 = vmatmul.mubr.f32.gmra.mxu0 %v684_v8  ;;  %v626_v40 = vadd.f32 %v490_v13, %v5431_v46  ;;  %v341_v41 = vcombine.high %v325_v10, %v325_v10  ;;  %v689_v42 = vmax.f32 %v625_v25, 0.0  ;;  %v627_v43 = vadd.f32 %v494_v26, %v5439_v56 }
 0x104   :  { %5165 = vmatprep.mubr.f32.mxu0 %v685_v11  ;;  %v498_v44 = vrot.slane %v339_v20, %v5424_v38  ;;  %v720_v45 = vmax.f32 %v656_v32, 0.0  ;;  %v658_v31 = vadd.f32 %v554_v19, %v5437_v54  ;;  %v439_v47 = vcombine.high %v423_v23, %v423_v23  ;;  %v5581_v32 = vld [vmem:[%s6988_s6] ss:$0 sm:$0xff] }
 0x105   :  { %v721_v48 = vmax.f32 %v657_v36, 0.0  ;;  %v659_v49 = vadd.f32 %v558_v37, %v5447_v63  ;;  %v562_v50 = vrot.slane %v437_v33, %v5424_v38  ;;  %v690_v30 = vmax.f32 %v626_v40, 0.0 }
 0x106   :  { %5211 = vmatmul.mubr.f32.gmra.mxu1 %v716_v14  ;;  %v628_v51 = vadd.f32 %v494_v26, %v5431_v46  ;;  %v691_v52 = vmax.f32 %v627_v43, 0.0  ;;  %v629_v53 = vadd.f32 %v498_v44, %v5439_v56  ;;  %v502_v55 = vrot.slane %v341_v41, %v5424_v38 }
 0x107   :  { %5213 = vmatprep.mubr.f32.mxu1 %v717_v17  ;;  %5166 = vmatmul.mubr.f32.gmra.mxu0 %v686_v21  ;;  %v343_v57 = vcombine.high %v339_v20, %v339_v20  ;;  %v722_v58 = vmax.f32 %v658_v31, 0.0  ;;  %v660_v59 = vadd.f32 %v558_v37, %v5437_v54  ;;  %v723_v35 = vmax.f32 %v659_v49, 0.0 }
 0x108   :  { %5168 = vmatprep.mubr.f32.mxu0 %v687_v24  ;;  %v661_v60 = vadd.f32 %v562_v50, %v5447_v63  ;;  %v566_v61 = vrot.slane %v439_v47, %v5424_v38  ;;  %v441_v62 = vcombine.high %v437_v33, %v437_v33  ;;  %v692_v0 = vmax.f32 %v628_v51, 0.0 }
 0x109   :  { %v630_v1 = vadd.f32 %v498_v44, %v5431_v46  ;;  %v693_v2 = vmax.f32 %v629_v53, 0.0  ;;  %v631_v3 = vadd.f32 %v502_v55, %v5439_v56  ;;  %v506_v4 = vrot.slane %v343_v57, %v5424_v38 }
 0x10a   :  { %5214 = vmatmul.mubr.f32.gmra.mxu1 %v718_v28  ;;  %v724_v5 = vmax.f32 %v660_v59, 0.0  ;;  %v662_v6 = vadd.f32 %v562_v50, %v5437_v54  ;;  %v725_v7 = vmax.f32 %v661_v60, 0.0  ;;  %v663_v8 = vadd.f32 %v566_v61, %v5447_v63 }
 0x10b   :  { %5216 = vmatprep.mubr.f32.mxu1 %v719_v34  ;;  %5169 = vmatmul.mubr.f32.gmra.mxu0 %v688_v39  ;;  %v570_v9 = vrot.slane %v441_v62, %v5424_v38  ;;  %v694_v10 = vmax.f32 %v630_v1, 0.0  ;;  %v632_v11 = vadd.f32 %v502_v55, %v5431_v46  ;;  %v695_v12 = vmax.f32 %v631_v3, 0.0 }
 0x10c   :  { %5171 = vmatprep.mubr.f32.mxu0 %v689_v42  ;;  %v633_v13 = vadd.f32 %v506_v4, %v5439_v56  ;;  %v726_v14 = vmax.f32 %v662_v6, 0.0  ;;  %v664_v15 = vadd.f32 %v566_v61, %v5437_v54  ;;  %v727_v16 = vmax.f32 %v663_v8, 0.0 }
 0x10d   :  { %v665_v17 = vadd.f32 %v570_v9, %v5447_v63  ;;  %v696_v18 = vmax.f32 %v632_v11, 0.0  ;;  %v634_v38 = vadd.f32 %v506_v4, %v5431_v46  ;;  %v666_v21 = vadd.f32 %v570_v9, %v5437_v54  ;;  %v5574_v63 = vld [vmem:[%s6987_s5] ss:$0 sm:$0xff]  ;;  %s5333_s5 = smov [#allocation6]  }
 0x10e   :  { %5217 = vmatmul.mubr.f32.gmra.mxu1 %v720_v45  ;;  %v697_v19 = vmax.f32 %v633_v13, 0.0  ;;  %v728_v20 = vmax.f32 %v664_v15, 0.0  ;;  %s4978_s6 = sshll.u32 %s5333_s5, 4  ;;  %s4979_s6 = int_to_ptr.vmem [resolvable:$true] %s4978_s6 }
 0x10f   :  { %5219 = vmatprep.mubr.f32.mxu1 %v721_v48  ;;  %5172 = vmatmul.mubr.f32.gmra.mxu0 %v690_v30  ;;  %v729_v56 = vmax.f32 %v665_v17, 0.0  ;;  %v698_v22 = vmax.f32 %v634_v38, 0.0  ;;  %v730_v23 = vmax.f32 %v666_v21, 0.0  ;;  %s5299_s26 = scalar_lea.vmem %s4979_s6, 64  ;;  %p5304_p6 = scmp.lt.s32.totalorder %s4979_s6, %s4979_s6 }
 0x110   :  { %5174 = vmatprep.mubr.f32.mxu0 %v691_v52  ;;  %p5300_p5 = scmp.ne.s32.totalorder %s4979_s6, %s5299_s26  ;;  %p5305_p7 = scmp.lt.s32.totalorder %s5299_s26, %s5299_s26 }
 0x112   :  { %5220 = vmatmul.mubr.f32.gmra.mxu1 %v722_v58  ;;  %p5306_p8 = por %p5305_p7, %p5304_p6 }
 0x113   :  { %5222 = vmatprep.mubr.f32.mxu1 %v723_v35  ;;  %5175 = vmatmul.mubr.f32.gmra.mxu0 %v692_v0 }
 0x114   :  { %5177 = vmatprep.mubr.f32.mxu0 %v693_v2  ;;  %p5307_p9 = pnand %p5306_p8, %p5300_p5 }
 0x116   :  { %5223 = vmatmul.mubr.f32.gmra.mxu1 %v724_v5 }
 0x117   :  { %5225 = vmatprep.mubr.f32.mxu1 %v725_v7  ;;  %5178 = vmatmul.mubr.f32.gmra.mxu0 %v694_v10 }
 0x118   :  { %5180 = vmatprep.mubr.f32.mxu0 %v695_v12 }
 0x11a   :  { %5226 = vmatmul.mubr.f32.gmra.mxu1 %v726_v14 }
 0x11b   :  { %5228 = vmatprep.mubr.f32.mxu1 %v727_v16  ;;  %5181 = vmatmul.mubr.f32.gmra.mxu0 %v696_v18 }
 0x11c   :  { %5183 = vmatprep.mubr.f32.mxu0 %v697_v19 }
 0x11e   :  { %5229 = vmatmul.mubr.f32.gmra.mxu1 %v728_v20 }
 0x11f   :  { %5231 = vmatprep.mubr.f32.mxu1 %v729_v56  ;;  %5184 = vmatmul.mubr.f32.gmra.mxu0 %v698_v22 }
 0x122   :  { %5232 = vmatmul.mubr.f32.gmra.mxu1 %v730_v23 }
 0x1a3   :  { %v5140_v46 = vpop.f32.mrf.mxu0 }
 0x1a4   :  { %v826_v24 = vadd.f32 %v5140_v46, %v5574_v63 }
 0x1a5   :  { %v820_v25 = vpop.f32.mrf.mxu0 }
 0x1a6   :  { %v5188_v26 = vpop.f32.mrf.mxu1  ;;  %v1140_v28 = vmax.f32 %v826_v24, 0.0  ;;  %v821_v54 = vadd.f32 %v5574_v63, %v820_v25 }
 0x1a7   :  { %v5143_v33 = vpop.f32.mrf.mxu0  ;;  %v986_v37 = vadd.f32 %v5188_v26, %v5574_v63 }
 0x1a8   :  { %v980_v34 = vpop.f32.mrf.mxu1  ;;  %v836_v36 = vadd.f32 %v5143_v33, %v5574_v63  ;;  %v1139_v39 = vmax.f32 %v821_v54, 0.0  ;;  %v1210_v42 = vmul.f32 %v5581_v32, %v1140_v28 }
 0x1a9   :  { %v830_v40 = vpop.f32.mrf.mxu0  ;;  %v981_v41 = vadd.f32 %v5574_v63, %v980_v34  ;;  %v1172_v47 = vmax.f32 %v986_v37, 0.0 }
 0x1aa   :  { %v5191_v43 = vpop.f32.mrf.mxu1  ;;  %v1142_v44 = vmax.f32 %v836_v36, 0.0  ;;  %1276 = vadd.xlane.f32.xlu0 %v1210_v42  ;;  %v831_v48 = vadd.f32 %v5574_v63, %v830_v40  ;;  %v1209_v51 = vmul.f32 %v5581_v32, %v1139_v39 }
 0x1ab   :  { %v5146_v45 = vpop.f32.mrf.mxu0  ;;  %v1171_v49 = vmax.f32 %v981_v41, 0.0  ;;  %v1242_v59 = vmul.f32 %v5581_v32, %v1172_v47  ;;  %v996_v5 = vadd.f32 %v5191_v43, %v5574_v63 }
 0x1ac   :  { %v990_v31 = vpop.f32.mrf.mxu1  ;;  %v1212_v30 = vmul.f32 %v5581_v32, %v1142_v44  ;;  %v846_v58 = vadd.f32 %v5146_v45, %v5574_v63  ;;  %v1141_v35 = vmax.f32 %v831_v48, 0.0 }
 0x1ad   :  { %v840_v50 = vpop.f32.mrf.mxu0  ;;  %v991_v61 = vadd.f32 %v5574_v63, %v990_v31  ;;  %v1241_v0 = vmul.f32 %v5581_v32, %v1171_v49  ;;  %v1174_v14 = vmax.f32 %v996_v5, 0.0 }
 0x1ae   :  { %v5194_v52 = vpop.f32.mrf.mxu1  ;;  %v841_v53 = vadd.f32 %v5574_v63, %v840_v50  ;;  %1280 = vadd.xlane.f32.xlu1 %v1212_v30  ;;  %1274 = vadd.xlane.f32.xlu0 %v1209_v51  ;;  %v1144_v4 = vmax.f32 %v846_v58, 0.0  ;;  %v1211_v9 = vmul.f32 %v5581_v32, %v1141_v35 }
 0x1af   :  { %v5149_v55 = vpop.f32.mrf.mxu0  ;;  %v1173_v6 = vmax.f32 %v991_v61, 0.0  ;;  %v1006_v21 = vadd.f32 %v5194_v52, %v5574_v63  ;;  %v1244_v25 = vmul.f32 %v5581_v32, %v1174_v14 }
 0x1b0   :  { %v1000_v57 = vpop.f32.mrf.mxu1  ;;  %v1143_v60 = vmax.f32 %v841_v53, 0.0  ;;  %v856_v15 = vadd.f32 %v5149_v55, %v5574_v63  ;;  %v1214_v38 = vmul.f32 %v5581_v32, %v1144_v4 }
 0x1b1   :  { %v850_v62 = vpop.f32.mrf.mxu0  ;;  %v1001_v16 = vadd.f32 %v5574_v63, %v1000_v57  ;;  %v1243_v19 = vmul.f32 %v5581_v32, %v1173_v6  ;;  %v1176_v37 = vmax.f32 %v1006_v21, 0.0 }
 0x1b2   :  { %v5197_v1 = vpop.f32.mrf.mxu1  ;;  %1340 = vadd.xlane.f32.xlu1 %v1242_v59  ;;  %1338 = vadd.xlane.f32.xlu0 %v1241_v0  ;;  %v851_v7 = vadd.f32 %v5574_v63, %v850_v62  ;;  %v1213_v10 = vmul.f32 %v5581_v32, %v1143_v60  ;;  %v1146_v23 = vmax.f32 %v856_v15, 0.0 }
 0x1b3   :  { %v5152_v2 = vpop.f32.mrf.mxu0  ;;  %v1175_v46 = vmax.f32 %v1001_v16, 0.0  ;;  %v1016_v24 = vadd.f32 %v5197_v1, %v5574_v63  ;;  %v1246_v58 = vmul.f32 %v5581_v32, %v1176_v37 }
 0x1b4   :  { %v1010_v3 = vpop.f32.mrf.mxu1  ;;  %v1145_v17 = vmax.f32 %v851_v7, 0.0  ;;  %v866_v26 = vadd.f32 %v5152_v2, %v5574_v63  ;;  %v1216_v43 = vmul.f32 %v5581_v32, %v1146_v23 }
 0x1b5   :  { %v860_v8 = vpop.f32.mrf.mxu0  ;;  %v1011_v54 = vadd.f32 %v5574_v63, %v1010_v3  ;;  %v1178_v42 = vmax.f32 %v1016_v24, 0.0  ;;  %v1245_v44 = vmul.f32 %v5581_v32, %v1175_v46 }
 0x1b6   :  { %v5200_v11 = vpop.f32.mrf.mxu1  ;;  %1278 = vadd.xlane.f32.xlu1 %v1211_v9  ;;  %1282 = vadd.xlane.f32.xlu0 %v1213_v10  ;;  %v861_v28 = vadd.f32 %v5574_v63, %v860_v8  ;;  %v1215_v34 = vmul.f32 %v5581_v32, %v1145_v17  ;;  %v1148_v45 = vmax.f32 %v866_v26, 0.0 }
 0x1b7   :  { %v5155_v12 = vpop.f32.mrf.mxu0  ;;  %v1026_v39 = vadd.f32 %v5200_v11, %v5574_v63  ;;  %v1177_v47 = vmax.f32 %v1011_v54, 0.0  ;;  %v1248_v61 = vmul.f32 %v5581_v32, %v1178_v42 }
 0x1b8   :  { %v1020_v13 = vpop.f32.mrf.mxu1  ;;  %v1147_v31 = vmax.f32 %v861_v28, 0.0  ;;  %v876_v48 = vadd.f32 %v5155_v12, %v5574_v63  ;;  %v1218_v3 = vmul.f32 %v5581_v32, %v1148_v45 }
 0x1b9   :  { %v870_v18 = vpop.f32.mrf.mxu0  ;;  %v1021_v30 = vadd.f32 %v5574_v63, %v1020_v13  ;;  %v1180_v52 = vmax.f32 %v1026_v39, 0.0  ;;  %v1247_v4 = vmul.f32 %v5581_v32, %v1177_v47 }
 0x1ba   :  { %v5203_v20 = vpop.f32.mrf.mxu1  ;;  %1284 = vadd.xlane.f32.xlu1 %v1214_v38  ;;  %1342 = vadd.xlane.f32.xlu0 %v1243_v19  ;;  %v871_v53 = vadd.f32 %v5574_v63, %v870_v18  ;;  %v1150_v62 = vmax.f32 %v876_v48, 0.0  ;;  %v1217_v1 = vmul.f32 %v5581_v32, %v1147_v31 }
 0x1bb   :  { %v5158_v56 = vpop.f32.mrf.mxu0  ;;  %v1179_v5 = vmax.f32 %v1021_v30, 0.0  ;;  %v1036_v10 = vadd.f32 %v5203_v20, %v5574_v63  ;;  %v5639_v13 = vmul.f32 %v5581_v32, %v1180_v52 }
 0x1bc   :  { %v1030_v22 = vpop.f32.mrf.mxu1  ;;  %v1149_v9 = vmax.f32 %v871_v53, 0.0  ;;  %v5645_v15 = vadd.f32 %v5158_v56, %v5574_v63  ;;  %v1220_v21 = vmul.f32 %v5581_v32, %v1150_v62 }
 0x1bd   :  { %v5609_v33 = vpop.f32.mrf.mxu0  ;;  %v5650_v38 = vadd.f32 %v5574_v63, %v1030_v22  ;;  %v1182_v28 = vmax.f32 %v1036_v10, 0.0  ;;  %v1249_v37 = vmul.f32 %v5581_v32, %v1179_v5 }
 0x1be   :  { %v5612_v36 = vpop.f32.mrf.mxu1  ;;  %1344 = vadd.xlane.f32.xlu1 %v1244_v25  ;;  %1286 = vadd.xlane.f32.xlu0 %v1215_v34  ;;  %v881_v22 = vadd.f32 %v5574_v63, %v5609_v33  ;;  %v1219_v47 = vmul.f32 %v5581_v32, %v1149_v9 }
 0x1bf   :  { %v5615_v40 = vpop.f32.mrf.mxu0  ;;  %v5671_v31 = vadd.f32 %v5612_v36, %v5574_v63 }
 0x1c0   :  { %v5617_v41 = vpop.f32.mrf.mxu1 }
 0x1c1   :  { %v5622_v49 = vpop.f32.mrf.mxu0 }
 0x1c2   :  { %v5209_v50 = vpop.f32.mrf.mxu1  ;;  %1288 = vadd.xlane.f32.xlu1 %v1216_v43  ;;  %1346 = vadd.xlane.f32.xlu0 %v1245_v44 }
 0x1c3   :  { %v1056_v51 = vadd.f32 %v5209_v50, %v5574_v63  ;;  %v5164_v55 = vpop.f32.mrf.mxu0 }
 0x1c4   :  { %v1050_v57 = vpop.f32.mrf.mxu1  ;;  %v906_v59 = vadd.f32 %v5164_v55, %v5574_v63 }
 0x1c5   :  { %v1186_v35 = vmax.f32 %v1056_v51, 0.0  ;;  %v1051_v60 = vadd.f32 %v5574_v63, %v1050_v57  ;;  %v5631_v0 = vpop.f32.mrf.mxu0  ;;  %v1152_v57 = vmax.f32 %v5645_v15, 0.0  ;;  %v1181_v15 = vmax.f32 %v5650_v38, 0.0 }
 0x1c6   :  { %v5212_v2 = vpop.f32.mrf.mxu1  ;;  %v1156_v6 = vmax.f32 %v906_v59, 0.0  ;;  %1348 = vadd.xlane.f32.xlu1 %v1246_v58  ;;  %1290 = vadd.xlane.f32.xlu0 %v1217_v1  ;;  %v5684_v59 = vmul.f32 %v5581_v32, %v1182_v28 }
 0x1c7   :  { %v1185_v7 = vmax.f32 %v1051_v60, 0.0  ;;  %v1066_v8 = vadd.f32 %v5212_v2, %v5574_v63  ;;  %v5167_v11 = vpop.f32.mrf.mxu0  ;;  %v5642_v14 = vmul.f32 %v5581_v32, %v1186_v35 }
 0x1c8   :  { %v1060_v12 = vpop.f32.mrf.mxu1  ;;  %v916_v16 = vadd.f32 %v5167_v11, %v5574_v63  ;;  %v5654_v23 = vmul.f32 %v5581_v32, %v1156_v6 }
 0x1c9   :  { %v1188_v17 = vmax.f32 %v1066_v8, 0.0  ;;  %v1061_v18 = vadd.f32 %v5574_v63, %v1060_v12  ;;  %v910_v19 = vpop.f32.mrf.mxu0  ;;  %v5657_v46 = vmul.f32 %v5581_v32, %v1185_v7 }
 0x1ca   :  { %v5215_v20 = vpop.f32.mrf.mxu1  ;;  %v1158_v56 = vmax.f32 %v916_v16, 0.0  ;;  %v911_v24 = vadd.f32 %v5574_v63, %v910_v19  ;;  %1292 = vadd.xlane.f32.xlu1 %v1218_v3  ;;  %1350 = vadd.xlane.f32.xlu0 %v1247_v4  ;;  %v1151_v4 = vmax.f32 %v881_v22, 0.0 }
 0x1cb   :  { %v1187_v25 = vmax.f32 %v1061_v18, 0.0  ;;  %v1076_v26 = vadd.f32 %v5215_v20, %v5574_v63  ;;  %v5170_v54 = vpop.f32.mrf.mxu0  ;;  %v5665_v39 = vmul.f32 %v5581_v32, %v1188_v17 }
 0x1cc   :  { %v1070_v34 = vpop.f32.mrf.mxu1  ;;  %v1157_v42 = vmax.f32 %v911_v24, 0.0  ;;  %v926_v43 = vadd.f32 %v5170_v54, %v5574_v63  ;;  %v5675_v50 = vmul.f32 %v5581_v32, %v1158_v56 }
 0x1cd   :  { %v1190_v44 = vmax.f32 %v1076_v26, 0.0  ;;  %v1071_v45 = vadd.f32 %v5574_v63, %v1070_v34  ;;  %v920_v33 = vpop.f32.mrf.mxu0  ;;  %v5678_v30 = vmul.f32 %v5581_v32, %v1187_v25 }
 0x1ce   :  { %v5218_v48 = vpop.f32.mrf.mxu1  ;;  %v1160_v51 = vmax.f32 %v926_v43, 0.0  ;;  %v921_v52 = vadd.f32 %v5574_v63, %v920_v33  ;;  %1352 = vadd.xlane.f32.xlu1 %v1248_v61  ;;  %1294 = vadd.xlane.f32.xlu0 %v1219_v47  ;;  %v5687_v35 = vmul.f32 %v5581_v32, %v1157_v42  ;;  %v5696_v61 = vadd.f32 %v5615_v40, %v5574_v63 }
 0x1cf   :  { %v1189_v53 = vmax.f32 %v1071_v45, 0.0  ;;  %v1086_v55 = vadd.f32 %v5218_v48, %v5574_v63  ;;  %v5173_v36 = vpop.f32.mrf.mxu0  ;;  %v5690_v60 = vmul.f32 %v5581_v32, %v1190_v44  ;;  %v5709_v40 = vadd.f32 %v5574_v63, %v5617_v41 }
 0x1d0   :  { %v1080_v58 = vpop.f32.mrf.mxu1  ;;  %v1159_v62 = vmax.f32 %v921_v52, 0.0  ;;  %v936_v1 = vadd.f32 %v5173_v36, %v5574_v63  ;;  %v5699_v7 = vmul.f32 %v5581_v32, %v1160_v51  ;;  %v891_v41 = vadd.f32 %v5574_v63, %v5622_v49 }
 0x1d1   :  { %v1192_v2 = vmax.f32 %v1086_v55, 0.0  ;;  %v1081_v3 = vadd.f32 %v5574_v63, %v1080_v58  ;;  %v930_v5 = vpop.f32.mrf.mxu0  ;;  %v5702_v8 = vmul.f32 %v5581_v32, %v1189_v53  ;;  %v1222_v44 = vmul.f32 %v5581_v32, %v1152_v57 }
 0x1d2   :  { %v5221_v6 = vpop.f32.mrf.mxu1  ;;  %v1162_v9 = vmax.f32 %v936_v1, 0.0  ;;  %v931_v10 = vadd.f32 %v5574_v63, %v930_v5  ;;  %1296 = vadd.xlane.f32.xlu1 %v1220_v21  ;;  %1354 = vadd.xlane.f32.xlu0 %v1249_v37  ;;  %v5712_v18 = vmul.f32 %v5581_v32, %v1159_v62  ;;  %v1221_v21 = vmul.f32 %v5581_v32, %v1151_v4 }
 0x1d3   :  { %v1191_v11 = vmax.f32 %v1081_v3, 0.0  ;;  %v1096_v12 = vadd.f32 %v5221_v6, %v5574_v63  ;;  %v5176_v16 = vpop.f32.mrf.mxu0  ;;  %v5715_v19 = vmul.f32 %v5581_v32, %v1192_v2  ;;  %v1153_v53 = vmax.f32 %v891_v41, 0.0 }
 0x1d4   :  { %v1090_v17 = vpop.f32.mrf.mxu1  ;;  %v1161_v20 = vmax.f32 %v931_v10, 0.0  ;;  %v946_v56 = vadd.f32 %v5176_v16, %v5574_v63  ;;  %v5723_v28 = vmul.f32 %v5581_v32, %v1162_v9  ;;  %v1154_v4 = vmax.f32 %v5696_v61, 0.0 }
 0x1d5   :  { %v1194_v24 = vmax.f32 %v1096_v12, 0.0  ;;  %v1091_v38 = vadd.f32 %v5574_v63, %v1090_v17  ;;  %v940_v25 = vpop.f32.mrf.mxu0  ;;  %v5726_v22 = vmul.f32 %v5581_v32, %v1191_v11  ;;  %v1183_v5 = vmax.f32 %v5709_v40, 0.0 }
 0x1d6   :  { %v5224_v26 = vpop.f32.mrf.mxu1  ;;  %v1164_v54 = vmax.f32 %v946_v56, 0.0  ;;  %v941_v34 = vadd.f32 %v5574_v63, %v940_v25  ;;  %1356 = vadd.xlane.f32.xlu1 %v5639_v13  ;;  %1298 = vadd.xlane.f32.xlu0 %v1221_v21  ;;  %v5733_v45 = vmul.f32 %v5581_v32, %v1161_v20  ;;  %v1251_v13 = vmul.f32 %v5581_v32, %v1181_v15 }
 0x1d7   :  { %v1193_v37 = vmax.f32 %v1091_v38, 0.0  ;;  %v1106_v42 = vadd.f32 %v5224_v26, %v5574_v63  ;;  %v5179_v49 = vpop.f32.mrf.mxu0  ;;  %v5736_v33 = vmul.f32 %v5581_v32, %v1194_v24  ;;  %v901_v61 = vadd.f32 %v5574_v63, %v5631_v0 }
 0x1d8   :  { %v1100_v43 = vpop.f32.mrf.mxu1  ;;  %v1163_v47 = vmax.f32 %v941_v34, 0.0  ;;  %v956_v48 = vadd.f32 %v5179_v49, %v5574_v63  ;;  %v5742_v58 = vmul.f32 %v5581_v32, %v1164_v54  ;;  %v1223_v20 = vmul.f32 %v5581_v32, %v1153_v53 }
 0x1d9   :  { %v1196_v51 = vmax.f32 %v1106_v42, 0.0  ;;  %v1101_v52 = vadd.f32 %v5574_v63, %v1100_v43  ;;  %v950_v55 = vpop.f32.mrf.mxu0  ;;  %v5745_v57 = vmul.f32 %v5581_v32, %v1193_v37  ;;  %v1184_v54 = vmax.f32 %v5671_v31, 0.0 }
 0x1da   :  { %v5227_v36 = vpop.f32.mrf.mxu1  ;;  %v1166_v62 = vmax.f32 %v956_v48, 0.0  ;;  %v951_v1 = vadd.f32 %v5574_v63, %v950_v55  ;;  %1300 = vadd.xlane.f32.xlu1 %v1222_v44  ;;  %1358 = vadd.xlane.f32.xlu0 %v1251_v13  ;;  %v5752_v10 = vmul.f32 %v5581_v32, %v1163_v47  ;;  %v1224_v37 = vmul.f32 %v5581_v32, %v1154_v4 }
 0x1db   :  { %v1195_v2 = vmax.f32 %v1101_v52, 0.0  ;;  %v1116_v3 = vadd.f32 %v5227_v36, %v5574_v63  ;;  %v5182_v6 = vpop.f32.mrf.mxu0  ;;  %v5755_v11 = vmul.f32 %v5581_v32, %v1196_v51  ;;  %v1155_v51 = vmax.f32 %v901_v61, 0.0 }
 0x1dc   :  { %v1110_v9 = vpop.f32.mrf.mxu1  ;;  %v1165_v12 = vmax.f32 %v951_v1, 0.0  ;;  %v966_v15 = vadd.f32 %v5182_v6, %v5574_v63  ;;  %v5763_v24 = vmul.f32 %v5581_v32, %v1166_v62  ;;  %v1253_v31 = vmul.f32 %v5581_v32, %v1183_v5 }
 0x1dd   :  { %v1198_v16 = vmax.f32 %v1116_v3, 0.0  ;;  %v1111_v17 = vadd.f32 %v5574_v63, %v1110_v9  ;;  %v960_v40 = vpop.f32.mrf.mxu0  ;;  %v5766_v38 = vmul.f32 %v5581_v32, %v1195_v2 }
 0x1de   :  { %v5230_v56 = vpop.f32.mrf.mxu1  ;;  %v1168_v41 = vmax.f32 %v966_v15, 0.0  ;;  %v961_v25 = vadd.f32 %v5574_v63, %v960_v40  ;;  %1360 = vadd.xlane.f32.xlu1 %v5684_v59  ;;  %1302 = vadd.xlane.f32.xlu0 %v1223_v20  ;;  %v1235_v42 = vmul.f32 %v5581_v32, %v1165_v12  ;;  %v1254_v15 = vmul.f32 %v5581_v32, %v1184_v54 }
 0x1df   :  { %v1197_v21 = vmax.f32 %v1111_v17, 0.0  ;;  %v1126_v26 = vadd.f32 %v5230_v56, %v5574_v63  ;;  %v5185_v0 = vpop.f32.mrf.mxu0  ;;  %v1268_v49 = vmul.f32 %v5581_v32, %v1198_v16  ;;  %v1225_v16 = vmul.f32 %v5581_v32, %v1155_v51 }
 0x1e0   :  { %v1120_v34 = vpop.f32.mrf.mxu1  ;;  %v1167_v43 = vmax.f32 %v961_v25, 0.0  ;;  %v976_v44 = vadd.f32 %v5185_v0, %v5574_v63  ;;  %v1238_v53 = vmul.f32 %v5581_v32, %v1168_v41 }
 0x1e1   :  { %v1200_v47 = vmax.f32 %v1126_v26, 0.0  ;;  %v1121_v48 = vadd.f32 %v5574_v63, %v1120_v34  ;;  %v970_v52 = vpop.f32.mrf.mxu0  ;;  %v1267_v55 = vmul.f32 %v5581_v32, %v1197_v21 }
 0x1e2   :  { %v5233_v59 = vpop.f32.mrf.mxu1  ;;  %v1170_v13 = vmax.f32 %v976_v44, 0.0  ;;  %v971_v36 = vadd.f32 %v5574_v63, %v970_v52  ;;  %1304 = vadd.xlane.f32.xlu1 %v1224_v37  ;;  %1362 = vadd.xlane.f32.xlu0 %v1253_v31  ;;  %v1237_v3 = vmul.f32 %v5581_v32, %v1167_v43 }
 0x1e3   :  { %v1199_v62 = vmax.f32 %v1121_v48, 0.0  ;;  %v1136_v1 = vadd.f32 %v5233_v59, %v5574_v63  ;;  %v1270_v4 = vmul.f32 %v5581_v32, %v1200_v47 }
 0x1e4   :  { %v1130_v2 = vpop.f32.mrf.mxu1  ;;  %v1169_v6 = vmax.f32 %v971_v36, 0.0  ;;  %v1240_v12 = vmul.f32 %v5581_v32, %v1170_v13 }
 0x1e5   :  { %v1202_v5 = vmax.f32 %v1136_v1, 0.0  ;;  %v1131_v9 = vadd.f32 %v5574_v63, %v1130_v2  ;;  %v1269_v17 = vmul.f32 %v5581_v32, %v1199_v62  ;;  %v5328_v63 = vmov 269488144  }
 0x1e6   :  { %v1239_v40 = vmul.f32 %v5581_v32, %v1169_v6  ;;  %1364 = vadd.xlane.f32.xlu1 %v1254_v15  ;;  %1306 = vadd.xlane.f32.xlu0 %v1225_v16 }
 0x1e7   :  { %v1201_v61 = vmax.f32 %v1131_v9, 0.0  ;;  %v1272_v20 = vmul.f32 %v5581_v32, %v1202_v5 }
 0x1e9   :  { %v1271_v56 = vmul.f32 %v5581_v32, %v1201_v61  ;;  %v1540_v32 = vunpack.c.l.s4 %v5328_v63 }
 0x1ea   :  { %1308 = vadd.xlane.f32.xlu1 %v5654_v23  ;;  %1366 = vadd.xlane.f32.xlu0 %v5657_v46  ;;  %v5330_v46 = vmov 1414812756  }
 0x1ee   :  { %1368 = vadd.xlane.f32.xlu1 %v5642_v14  ;;  %1310 = vadd.xlane.f32.xlu0 %v5687_v35  ;;  %v5329_v14 = vmov 842150450   ;;  %v1541_v35 = vunpack.c.0.s8 %v1540_v32 }
 0x1ef   :  { %v1547_v23 = vunpack.c.l.s4 %v5329_v14 }
 0x1f2   :  { %1312 = vadd.xlane.f32.xlu1 %v5675_v50  ;;  %1370 = vadd.xlane.f32.xlu0 %v5678_v30  ;;  %v5331_v50 = vmov 1987475062  }
 0x1f3   :  { %v1561_v30 = vunpack.c.l.s4 %v5331_v50 }
 0x1f6   :  { %1372 = vadd.xlane.f32.xlu1 %v5665_v39  ;;  %1314 = vadd.xlane.f32.xlu0 %v5712_v18  ;;  %v1554_v39 = vunpack.c.l.s4 %v5330_v46  ;;  %v5814_v18 = vpop.permute.xlu0 %1408 }
 0x1fa   :  { %1316 = vadd.xlane.f32.xlu1 %v5699_v7  ;;  %1374 = vadd.xlane.f32.xlu0 %v5702_v8  ;;  %v1555_v7 = vunpack.c.0.s8 %v1554_v39  ;;  %v1562_v8 = vunpack.c.0.s8 %v1561_v30 }
 0x1fe   :  { %1376 = vadd.xlane.f32.xlu1 %v5690_v60  ;;  %1318 = vadd.xlane.f32.xlu0 %v5733_v45  ;;  %v1548_v60 = vunpack.c.0.s8 %v1547_v23 }
 0x200   :  { %v5820_v45 = vsub.s32 %v1548_v60, %v5412_v29 }
 0x202   :  { %1320 = vadd.xlane.f32.xlu1 %v5723_v28  ;;  %1378 = vadd.xlane.f32.xlu0 %v5726_v22  ;;  %v5817_v22 = vsub.s32 %v1541_v35, %v5412_v29 }
 0x206   :  { %1380 = vadd.xlane.f32.xlu1 %v5715_v19  ;;  %1322 = vadd.xlane.f32.xlu0 %v5752_v10  ;;  %v5332_v19 = vmov 1983009808  }
 0x207   :  { %v3334_v28 = vunpack.c.l.s4 %v5332_v19 }
 0x209   :  { %v3335_v10 = vunpack.c.0.s8 %v3334_v28 }
 0x20a   :  { %1324 = vadd.xlane.f32.xlu1 %v5742_v58  ;;  %1382 = vadd.xlane.f32.xlu0 %v5745_v57  ;;  %v5826_v58 = vsub.s32 %v1562_v8, %v5412_v29 }
 0x20b   :  { %v5834_v54 = vsub.s32 %v3335_v10, %v5412_v29 }
 0x20e   :  { %1384 = vadd.xlane.f32.xlu1 %v5736_v33  ;;  %1326 = vadd.xlane.f32.xlu0 %v1235_v42  ;;  %v5823_v33 = vsub.s32 %v1555_v7, %v5412_v29 }
 0x212   :  { %1328 = vadd.xlane.f32.xlu1 %v5763_v24  ;;  %1386 = vadd.xlane.f32.xlu0 %v5766_v38 }
 0x216   :  { %1388 = vadd.xlane.f32.xlu1 %v5755_v11  ;;  %1330 = vadd.xlane.f32.xlu0 %v1237_v3 }
 0x21a   :  { %1332 = vadd.xlane.f32.xlu1 %v1238_v53  ;;  %1390 = vadd.xlane.f32.xlu0 %v1267_v55 }
 0x21e   :  { %1392 = vadd.xlane.f32.xlu1 %v1268_v49  ;;  %1334 = vadd.xlane.f32.xlu0 %v1239_v40 }
 0x222   :  { %1336 = vadd.xlane.f32.xlu1 %v1240_v12  ;;  %1394 = vadd.xlane.f32.xlu0 %v1269_v17 }
 0x226   :  { %1396 = vadd.xlane.f32.xlu1 %v1270_v4  ;;  %1398 = vadd.xlane.f32.xlu0 %v1271_v56 }
 0x22a   :  { %1400 = vadd.xlane.f32.xlu1 %v1272_v20 }
 0x233   :  { %v1277_v57 = vpop.xlane.xlu0 %1276 }
 0x234   :  { %v1412_v11 = vadd.f32 %v5814_v18, %v1277_v57 }
 0x236   :  { %v1573_v24 = vrot.slane %v1412_v11, %v5817_v22  ;;  %v1580_v38 = vrot.slane %v1412_v11, %v5820_v45  ;;  %v1587_v41 = vrot.slane %v1412_v11, %v5823_v33  ;;  %v1594_v25 = vrot.slane %v1412_v11, %v5826_v58 }
 0x237   :  { %v1281_v21 = vpop.xlane.xlu1 %1280  ;;  %v1275_v26 = vpop.xlane.xlu0 %1274 }
 0x238   :  { %v1414_v0 = vadd.f32 %v5814_v18, %v1281_v21  ;;  %v1411_v34 = vadd.f32 %v5814_v18, %v1275_v26  ;;  %v3348_v37 = vcombine.low %v1573_v24, %v1580_v38  ;;  %v3349_v42 = vcombine.low %v1587_v41, %v1594_v25 }
 0x23a   :  { %v1629_v49 = vrot.slane %v1414_v0, %v5817_v22  ;;  %v1636_v43 = vrot.slane %v1414_v0, %v5820_v45  ;;  %v1643_v44 = vrot.slane %v1414_v0, %v5823_v33  ;;  %v1650_v47 = vrot.slane %v1414_v0, %v5826_v58 }
 0x23b   :  { %v1545_v48 = vrot.slane %v1411_v34, %v5817_v22  ;;  %v1552_v51 = vrot.slane %v1411_v34, %v5820_v45  ;;  %v1559_v52 = vrot.slane %v1411_v34, %v5823_v33  ;;  %v1566_v31 = vrot.slane %v1411_v34, %v5826_v58  ;;  %v1341_v59 = vpop.xlane.xlu1 %1340  ;;  %v1339_v53 = vpop.xlane.xlu0 %1338 }
 0x23c   :  { %v1444_v55 = vadd.f32 %v5814_v18, %v1341_v59  ;;  %v1443_v13 = vadd.f32 %v5814_v18, %v1339_v53  ;;  %v3356_v36 = vrot.slane %v3348_v37, %v5834_v54  ;;  %v3363_v62 = vrot.slane %v3349_v42, %v5834_v54 }
 0x23d   :  { %v3331_v1 = vcombine.low %v1545_v48, %v1552_v51  ;;  %v3332_v2 = vcombine.low %v1559_v52, %v1566_v31  ;;  %v3382_v3 = vcombine.low %v1629_v49, %v1636_v43  ;;  %v3383_v4 = vcombine.low %v1643_v44, %v1650_v47 }
 0x23e   :  { %v2469_v6 = vrot.slane %v1444_v55, %v5817_v22  ;;  %v2476_v5 = vrot.slane %v1444_v55, %v5820_v45  ;;  %v2441_v9 = vrot.slane %v1443_v13, %v5817_v22  ;;  %v2448_v12 = vrot.slane %v1443_v13, %v5820_v45 }
 0x23f   :  { %v1279_v15 = vpop.xlane.xlu1 %1278  ;;  %v1283_v16 = vpop.xlane.xlu0 %1282  ;;  %v2483_v17 = vrot.slane %v1444_v55, %v5823_v33  ;;  %v3364_v61 = vcombine.low %v3356_v36, %v3363_v62  ;;  %v3339_v20 = vrot.slane %v3331_v1, %v5834_v54  ;;  %v2490_v56 = vrot.slane %v1444_v55, %v5826_v58 }
 0x240   :  { %v1413_v40 = vadd.f32 %v5814_v18, %v1279_v15  ;;  %v2455_v63 = vrot.slane %v1443_v13, %v5823_v33  ;;  %v2462_v32 = vrot.slane %v1443_v13, %v5826_v58  ;;  %v3346_v14 = vrot.slane %v3332_v2, %v5834_v54 }
 0x241   :  { %4423 = vperm.xlu1 %5278, %v3364_v61   ;;  %v5862_v23 = vadd.f32 %v5814_v18, %v1283_v16  ;;  %v3875_v46 = vcombine.low %v2441_v9, %v2448_v12  ;;  %v3390_v35 = vrot.slane %v3382_v3, %v5834_v54  ;;  %v3397_v60 = vrot.slane %v3383_v4, %v5834_v54 }
 0x242   :  { %v1601_v39 = vrot.slane %v1413_v40, %v5817_v22  ;;  %v1608_v7 = vrot.slane %v1413_v40, %v5820_v45  ;;  %v1615_v8 = vrot.slane %v1413_v40, %v5823_v33  ;;  %v3347_v19 = vcombine.low %v3339_v20, %v3346_v14 }
 0x243   :  { %v1285_v50 = vpop.xlane.xlu1 %1284  ;;  %v1343_v30 = vpop.xlane.xlu0 %1342  ;;  %v1622_v57 = vrot.slane %v1413_v40, %v5826_v58  ;;  %v3876_v10 = vcombine.low %v2455_v63, %v2462_v32  ;;  %v3892_v11 = vcombine.low %v2469_v6, %v2476_v5  ;;  %v3893_v24 = vcombine.low %v2483_v17, %v2490_v56 }
 0x244   :  { %v1445_v28 = vadd.f32 %v5814_v18, %v1343_v30  ;;  %v1657_v38 = vrot.slane %v5862_v23, %v5817_v22  ;;  %v1664_v41 = vrot.slane %v5862_v23, %v5820_v45  ;;  %v1416_v25 = vadd.f32 %v5814_v18, %v1285_v50 }
 0x245   :  { %4420 = vperm.xlu1 %5278, %v3347_v19   ;;  %v3883_v21 = vrot.slane %v3875_v46, %v5834_v54  ;;  %v1671_v26 = vrot.slane %v5862_v23, %v5823_v33  ;;  %v3398_v37 = vcombine.low %v3390_v35, %v3397_v60  ;;  %v3890_v44 = vrot.slane %v3876_v10, %v5834_v54 }
 0x246   :  { %v2497_v0 = vrot.slane %v1445_v28, %v5817_v22  ;;  %v2504_v34 = vrot.slane %v1445_v28, %v5820_v45  ;;  %v2511_v43 = vrot.slane %v1445_v28, %v5823_v33  ;;  %v3900_v48 = vrot.slane %v3892_v11, %v5834_v54 }
 0x247   :  { %v1345_v42 = vpop.xlane.xlu1 %1344  ;;  %v1287_v49 = vpop.xlane.xlu0 %1286  ;;  %v2518_v51 = vrot.slane %v1445_v28, %v5826_v58  ;;  %v3907_v52 = vrot.slane %v3893_v24, %v5834_v54  ;;  %v3365_v31 = vcombine.low %v1601_v39, %v1608_v7  ;;  %v3366_v59 = vcombine.low %v1615_v8, %v1622_v57 }
 0x248   :  { %v1446_v47 = vadd.f32 %v5814_v18, %v1345_v42  ;;  %v1685_v53 = vrot.slane %v1416_v25, %v5817_v22  ;;  %v3891_v55 = vcombine.low %v3883_v21, %v3890_v44  ;;  %v5889_v13 = vadd.f32 %v5814_v18, %v1287_v49 }
 0x249   :  { %4429 = vperm.xlu1 %5278, %v3398_v37   ;;  %v3909_v36 = vcombine.low %v2497_v0, %v2504_v34  ;;  %v1692_v62 = vrot.slane %v1416_v25, %v5820_v45  ;;  %v1699_v1 = vrot.slane %v1416_v25, %v5823_v33  ;;  %v1706_v2 = vrot.slane %v1416_v25, %v5826_v58 }
 0x24a   :  { %v2525_v3 = vrot.slane %v1446_v47, %v5817_v22  ;;  %4516 = vperm.xlu0 %5277, %v3891_v55   ;;  %v2532_v5 = vrot.slane %v1446_v47, %v5820_v45  ;;  %v2539_v9 = vrot.slane %v1446_v47, %v5823_v33  ;;  %v3908_v12 = vcombine.low %v3900_v48, %v3907_v52 }
 0x24b   :  { %v1289_v4 = vpop.xlane.xlu1 %1288  ;;  %v1347_v6 = vpop.xlane.xlu0 %1346  ;;  %v2546_v16 = vrot.slane %v1446_v47, %v5826_v58  ;;  %v3373_v17 = vrot.slane %v3365_v31, %v5834_v54  ;;  %v3380_v61 = vrot.slane %v3366_v59, %v5834_v54  ;;  %v3910_v40 = vcombine.low %v2511_v43, %v2518_v51 }
 0x24c   :  { %v1447_v15 = vadd.f32 %v5814_v18, %v1347_v6  ;;  %v1678_v20 = vrot.slane %v5862_v23, %v5826_v58  ;;  %v1713_v56 = vrot.slane %v5889_v13, %v5817_v22  ;;  %v5906_v63 = vadd.f32 %v5814_v18, %v1289_v4 }
 0x24d   :  { %4519 = vperm.xlu1 %5278, %v3908_v12   ;;  %v3917_v32 = vrot.slane %v3909_v36, %v5834_v54  ;;  %v1720_v14 = vrot.slane %v5889_v13, %v5820_v45  ;;  %v1727_v46 = vrot.slane %v5889_v13, %v5823_v33  ;;  %v3381_v60 = vcombine.low %v3373_v17, %v3380_v61 }
 0x24e   :  { %v2553_v39 = vrot.slane %v1447_v15, %v5817_v22  ;;  %v2560_v50 = vrot.slane %v1447_v15, %v5820_v45  ;;  %v3924_v7 = vrot.slane %v3910_v40, %v5834_v54  ;;  %v3416_v28 = vcombine.low %v1685_v53, %v1692_v62 }
 0x24f   :  { %v1349_v30 = vpop.xlane.xlu1 %1348  ;;  %v1291_v35 = vpop.xlane.xlu0 %1290  ;;  %v3417_v57 = vcombine.low %v1699_v1, %v1706_v2  ;;  %v3926_v10 = vcombine.low %v2525_v3, %v2532_v5  ;;  %v3927_v11 = vcombine.low %v2539_v9, %v2546_v16  ;;  %v1734_v24 = vrot.slane %v5889_v13, %v5826_v58 }
 0x250   :  { %v5917_v8 = vadd.f32 %v5814_v18, %v1349_v30  ;;  %v1419_v19 = vadd.f32 %v5814_v18, %v1291_v35  ;;  %v1741_v25 = vrot.slane %v5906_v63, %v5817_v22  ;;  %v1748_v21 = vrot.slane %v5906_v63, %v5820_v45 }
 0x251   :  { %4426 = vperm.xlu1 %5278, %v3381_v60   ;;  %v3925_v0 = vcombine.low %v3917_v32, %v3924_v7  ;;  %v1755_v34 = vrot.slane %v5906_v63, %v5823_v33  ;;  %v1762_v37 = vrot.slane %v5906_v63, %v5826_v58  ;;  %v2567_v42 = vrot.slane %v1447_v15, %v5823_v33 }
 0x252   :  { %v2574_v49 = vrot.slane %v1447_v15, %v5826_v58  ;;  %v2581_v47 = vrot.slane %v5917_v8, %v5817_v22  ;;  %v3424_v48 = vrot.slane %v3416_v28, %v5834_v54  ;;  %v3431_v51 = vrot.slane %v3417_v57, %v5834_v54 }
 0x253   :  { %v1293_v43 = vpop.xlane.xlu1 %1292  ;;  %v1351_v44 = vpop.xlane.xlu0 %1350  ;;  %4522 = vperm.xlu0 %5277, %v3925_v0   ;;  %v1769_v31 = vrot.slane %v1419_v19, %v5817_v22  ;;  %v3934_v59 = vrot.slane %v3926_v10, %v5834_v54  ;;  %v3941_v53 = vrot.slane %v3927_v11, %v5834_v54  ;;  %v3943_v55 = vcombine.low %v2553_v39, %v2560_v50 }
 0x254   :  { %v5937_v52 = vadd.f32 %v5814_v18, %v1293_v43  ;;  %v1776_v36 = vrot.slane %v1419_v19, %v5820_v45  ;;  %v1783_v62 = vrot.slane %v1419_v19, %v5823_v33  ;;  %v1790_v1 = vrot.slane %v1419_v19, %v5826_v58 }
 0x255   :  { %v3432_v2 = vcombine.low %v3424_v48, %v3431_v51  ;;  %v2588_v3 = vrot.slane %v5917_v8, %v5820_v45  ;;  %v2595_v4 = vrot.slane %v5917_v8, %v5823_v33  ;;  %v2602_v6 = vrot.slane %v5917_v8, %v5826_v58 }
 0x256   :  { %v1449_v5 = vadd.f32 %v5814_v18, %v1351_v44  ;;  %v1797_v15 = vrot.slane %v5937_v52, %v5817_v22  ;;  %v1804_v16 = vrot.slane %v5937_v52, %v5820_v45  ;;  %v3944_v17 = vcombine.low %v2567_v42, %v2574_v49 }
 0x257   :  { %v1353_v9 = vpop.xlane.xlu1 %1352  ;;  %v1295_v12 = vpop.xlane.xlu0 %1294  ;;  %4435 = vperm.xlu1 %5278, %v3432_v2   ;;  %v3951_v61 = vrot.slane %v3943_v55, %v5834_v54  ;;  %v3942_v40 = vcombine.low %v3934_v59, %v3941_v53  ;;  %v3399_v32 = vcombine.low %v1657_v38, %v1664_v41  ;;  %v3400_v39 = vcombine.low %v1671_v26, %v1678_v20 }
 0x258   :  { %v5958_v63 = vadd.f32 %v5814_v18, %v1353_v9  ;;  %v3958_v50 = vrot.slane %v3944_v17, %v5834_v54  ;;  %v1421_v30 = vadd.f32 %v5814_v18, %v1295_v12  ;;  %v3467_v35 = vcombine.low %v1769_v31, %v1776_v36 }
 0x259   :  { %v3468_v60 = vcombine.low %v1783_v62, %v1790_v1  ;;  %v2609_v7 = vrot.slane %v1449_v5, %v5817_v22  ;;  %v2616_v19 = vrot.slane %v1449_v5, %v5820_v45  ;;  %v2623_v28 = vrot.slane %v1449_v5, %v5823_v33 }
 0x25a   :  { %v2630_v57 = vrot.slane %v1449_v5, %v5826_v58  ;;  %v1811_v23 = vrot.slane %v5937_v52, %v5823_v33  ;;  %v1818_v41 = vrot.slane %v5937_v52, %v5826_v58  ;;  %v3959_v26 = vcombine.low %v3951_v61, %v3958_v50 }
 0x25b   :  { %v1297_v10 = vpop.xlane.xlu1 %1296  ;;  %v1355_v38 = vpop.xlane.xlu0 %1354  ;;  %4525 = vperm.xlu1 %5278, %v3942_v40   ;;  %v3450_v20 = vcombine.low %v1741_v25, %v1748_v21  ;;  %v2637_v11 = vrot.slane %v5958_v63, %v5817_v22  ;;  %v3407_v0 = vrot.slane %v3399_v32, %v5834_v54  ;;  %v3414_v42 = vrot.slane %v3400_v39, %v5834_v54 }
 0x25c   :  { %v3475_v49 = vrot.slane %v3467_v35, %v5834_v54  ;;  %4528 = vperm.xlu0 %5277, %v3959_v26   ;;  %v1825_v43 = vrot.slane %v1421_v30, %v5817_v22  ;;  %v3482_v44 = vrot.slane %v3468_v60, %v5834_v54  ;;  %v5987_v48 = vadd.f32 %v5814_v18, %v1297_v10 }
 0x25d   :  { %v3451_v51 = vcombine.low %v1755_v34, %v1762_v37  ;;  %v1832_v25 = vrot.slane %v1421_v30, %v5820_v45  ;;  %v3415_v21 = vcombine.low %v3407_v0, %v3414_v42  ;;  %v3977_v31 = vcombine.low %v2609_v7, %v2616_v19 }
 0x25e   :  { %v3978_v59 = vcombine.low %v2623_v28, %v2630_v57  ;;  %v1839_v36 = vrot.slane %v1421_v30, %v5823_v33  ;;  %v1846_v62 = vrot.slane %v1421_v30, %v5826_v58  ;;  %v3483_v1 = vcombine.low %v3475_v49, %v3482_v44 }
 0x25f   :  { %v1357_v53 = vpop.xlane.xlu1 %1356  ;;  %v1299_v55 = vpop.xlane.xlu0 %1298  ;;  %v3458_v2 = vrot.slane %v3450_v20, %v5834_v54  ;;  %v2644_v5 = vrot.slane %v5958_v63, %v5820_v45  ;;  %v2651_v34 = vrot.slane %v5958_v63, %v5823_v33  ;;  %v2658_v37 = vrot.slane %v5958_v63, %v5826_v58  ;;  %4432 = vperm.xlu1 %5278, %v3415_v21  }
 0x260   :  { %v1451_v9 = vadd.f32 %v5814_v18, %v1355_v38  ;;  %4444 = vperm.xlu0 %5277, %v3483_v1   ;;  %v1853_v12 = vrot.slane %v5987_v48, %v5817_v22  ;;  %v3465_v17 = vrot.slane %v3451_v51, %v5834_v54  ;;  %v3985_v61 = vrot.slane %v3977_v31, %v5834_v54 }
 0x261   :  { %v3992_v40 = vrot.slane %v3978_v59, %v5834_v54  ;;  %v1860_v32 = vrot.slane %v5987_v48, %v5820_v45  ;;  %v6008_v39 = vadd.f32 %v5814_v18, %v1357_v53  ;;  %v3960_v50 = vcombine.low %v2581_v47, %v2588_v3 }
 0x262   :  { %v3961_v30 = vcombine.low %v2595_v4, %v2602_v6  ;;  %v3466_v7 = vcombine.low %v3458_v2, %v3465_v17  ;;  %v3501_v28 = vcombine.low %v1825_v43, %v1832_v25  ;;  %v3502_v57 = vcombine.low %v1839_v36, %v1846_v62 }
 0x263   :  { %v1301_v35 = vpop.xlane.xlu1 %1300  ;;  %v1359_v60 = vpop.xlane.xlu0 %1358  ;;  %v3993_v19 = vcombine.low %v3985_v61, %v3992_v40  ;;  %v2665_v10 = vrot.slane %v1451_v9, %v5817_v22  ;;  %v2672_v38 = vrot.slane %v1451_v9, %v5820_v45  ;;  %v2679_v26 = vrot.slane %v1451_v9, %v5823_v33 }
 0x264   :  { %v2686_v20 = vrot.slane %v1451_v9, %v5826_v58  ;;  %v1867_v0 = vrot.slane %v5987_v48, %v5823_v33  ;;  %v1874_v8 = vrot.slane %v5987_v48, %v5826_v58  ;;  %4441 = vperm.xlu1 %5278, %v3466_v7   ;;  %v6022_v47 = vadd.f32 %v5814_v18, %v1299_v55 }
 0x265   :  { %4534 = vperm.xlu0 %5277, %v3993_v19   ;;  %v2693_v3 = vrot.slane %v6008_v39, %v5817_v22  ;;  %v3968_v4 = vrot.slane %v3960_v50, %v5834_v54  ;;  %v3975_v6 = vrot.slane %v3961_v30, %v5834_v54  ;;  %v3509_v42 = vrot.slane %v3501_v28, %v5834_v54 }
 0x266   :  { %v2700_v44 = vrot.slane %v6008_v39, %v5820_v45  ;;  %v3516_v51 = vrot.slane %v3502_v57, %v5834_v54  ;;  %v6033_v25 = vadd.f32 %v5814_v18, %v1301_v35  ;;  %v3433_v21 = vcombine.low %v1713_v56, %v1720_v14 }
 0x267   :  { %v1361_v49 = vpop.xlane.xlu1 %1360  ;;  %v1303_v43 = vpop.xlane.xlu0 %1302  ;;  %v3976_v31 = vcombine.low %v3968_v4, %v3975_v6  ;;  %v3434_v59 = vcombine.low %v1727_v46, %v1734_v24  ;;  %v4011_v53 = vcombine.low %v2665_v10, %v2672_v38  ;;  %v4012_v55 = vcombine.low %v2679_v26, %v2686_v20 }
 0x268   :  { %v2707_v36 = vrot.slane %v6008_v39, %v5823_v33  ;;  %v2714_v62 = vrot.slane %v6008_v39, %v5826_v58  ;;  %v1881_v1 = vrot.slane %v6022_v47, %v5817_v22  ;;  %v3517_v56 = vcombine.low %v3509_v42, %v3516_v51 }
 0x269   :  { %v1888_v14 = vrot.slane %v6022_v47, %v5820_v45  ;;  %v1895_v2 = vrot.slane %v6022_v47, %v5823_v33  ;;  %v1902_v13 = vrot.slane %v6022_v47, %v5826_v58  ;;  %4531 = vperm.xlu1 %5278, %v3976_v31   ;;  %v6060_v46 = vadd.f32 %v5814_v18, %v1359_v60 }
 0x26a   :  { %4450 = vperm.xlu0 %5277, %v3517_v56   ;;  %v1909_v17 = vrot.slane %v6033_v25, %v5817_v22  ;;  %v3441_v61 = vrot.slane %v3433_v21, %v5834_v54  ;;  %v3448_v40 = vrot.slane %v3434_v59, %v5834_v54  ;;  %v4019_v50 = vrot.slane %v4011_v53, %v5834_v54 }
 0x26b   :  { %v1305_v24 = vpop.xlane.xlu1 %1304  ;;  %v1363_v9 = vpop.xlane.xlu0 %1362  ;;  %v1916_v30 = vrot.slane %v6033_v25, %v5820_v45  ;;  %v4026_v35 = vrot.slane %v4012_v55, %v5834_v54  ;;  %v1454_v60 = vadd.f32 %v5814_v18, %v1361_v49  ;;  %v3484_v7 = vcombine.low %v1797_v15, %v1804_v16 }
 0x26c   :  { %v1923_v19 = vrot.slane %v6033_v25, %v5823_v33  ;;  %v3449_v28 = vcombine.low %v3441_v61, %v3448_v40  ;;  %v6080_v57 = vadd.f32 %v5814_v18, %v1303_v43  ;;  %v3485_v10 = vcombine.low %v1811_v23, %v1818_v41 }
 0x26d   :  { %v1930_v38 = vrot.slane %v6033_v25, %v5826_v58  ;;  %v2721_v15 = vrot.slane %v6060_v46, %v5817_v22  ;;  %v4027_v16 = vcombine.low %v4019_v50, %v4026_v35  ;;  %v6093_v26 = vadd.f32 %v5814_v18, %v1305_v24 }
 0x26e   :  { %v2728_v6 = vrot.slane %v6060_v46, %v5820_v45  ;;  %v2735_v42 = vrot.slane %v6060_v46, %v5823_v33  ;;  %4438 = vperm.xlu1 %5278, %v3449_v28   ;;  %v2749_v52 = vrot.slane %v1454_v60, %v5817_v22  ;;  %v2756_v23 = vrot.slane %v1454_v60, %v5820_v45 }
 0x26f   :  { %v1365_v20 = vpop.xlane.xlu1 %1364  ;;  %v1307_v4 = vpop.xlane.xlu0 %1306  ;;  %4540 = vperm.xlu0 %5277, %v4027_v16   ;;  %v2763_v41 = vrot.slane %v1454_v60, %v5823_v33  ;;  %v2770_v49 = vrot.slane %v1454_v60, %v5826_v58  ;;  %v3492_v43 = vrot.slane %v3484_v7, %v5834_v54  ;;  %v3499_v51 = vrot.slane %v3485_v10, %v5834_v54 }
 0x270   :  { %v2742_v21 = vrot.slane %v6060_v46, %v5826_v58  ;;  %v1937_v31 = vrot.slane %v6080_v57, %v5817_v22  ;;  %v1944_v59 = vrot.slane %v6080_v57, %v5820_v45  ;;  %v6112_v53 = vadd.f32 %v5814_v18, %v1363_v9 }
 0x271   :  { %v1951_v55 = vrot.slane %v6080_v57, %v5823_v33  ;;  %v1958_v56 = vrot.slane %v6080_v57, %v5826_v58  ;;  %v3500_v24 = vcombine.low %v3492_v43, %v3499_v51  ;;  %v1965_v61 = vrot.slane %v6093_v26, %v5817_v22 }
 0x272   :  { %v1972_v35 = vrot.slane %v6093_v26, %v5820_v45  ;;  %v3994_v9 = vcombine.low %v2637_v11, %v2644_v5  ;;  %v3995_v60 = vcombine.low %v2651_v34, %v2658_v37  ;;  %v6135_v7 = vadd.f32 %v5814_v18, %v1365_v20 }
 0x273   :  { %v1309_v40 = vpop.xlane.xlu1 %1308  ;;  %v1367_v50 = vpop.xlane.xlu0 %1366  ;;  %4447 = vperm.xlu1 %5278, %v3500_v24   ;;  %v3518_v28 = vcombine.low %v1853_v12, %v1860_v32  ;;  %v3519_v11 = vcombine.low %v1867_v0, %v1874_v8  ;;  %v4062_v63 = vcombine.low %v2749_v52, %v2756_v23  ;;  %v4063_v5 = vcombine.low %v2763_v41, %v2770_v49 }
 0x274   :  { %v1979_v34 = vrot.slane %v6093_v26, %v5823_v33  ;;  %v1986_v37 = vrot.slane %v6093_v26, %v5826_v58  ;;  %v4002_v10 = vrot.slane %v3994_v9, %v5834_v54  ;;  %v4009_v16 = vrot.slane %v3995_v60, %v5834_v54 }
 0x275   :  { %v2777_v12 = vrot.slane %v6112_v53, %v5817_v22  ;;  %v2784_v32 = vrot.slane %v6112_v53, %v5820_v45  ;;  %v2791_v48 = vrot.slane %v6112_v53, %v5823_v33  ;;  %v6162_v0 = vadd.f32 %v5814_v18, %v1307_v4 }
 0x276   :  { %v2798_v52 = vrot.slane %v6112_v53, %v5826_v58  ;;  %v4010_v23 = vcombine.low %v4002_v10, %v4009_v16  ;;  %v2805_v41 = vrot.slane %v6135_v7, %v5817_v22  ;;  %v3526_v49 = vrot.slane %v3518_v28, %v5834_v54 }
 0x277   :  { %v1369_v8 = vpop.xlane.xlu1 %1368  ;;  %v1311_v20 = vpop.xlane.xlu0 %1310  ;;  %v3533_v43 = vrot.slane %v3519_v11, %v5834_v54  ;;  %v4070_v51 = vrot.slane %v4062_v63, %v5834_v54  ;;  %v4077_v24 = vrot.slane %v4063_v5, %v5834_v54  ;;  %v6173_v4 = vadd.f32 %v5814_v18, %v1309_v40 }
 0x278   :  { %4537 = vperm.xlu1 %5278, %v4010_v23   ;;  %v2812_v9 = vrot.slane %v6135_v7, %v5820_v45  ;;  %v4028_v60 = vcombine.low %v2693_v3, %v2700_v44  ;;  %v4029_v28 = vcombine.low %v2707_v36, %v2714_v62  ;;  %v3535_v40 = vcombine.low %v1881_v1, %v1888_v14 }
 0x279   :  { %v2819_v11 = vrot.slane %v6135_v7, %v5823_v33  ;;  %v2826_v3 = vrot.slane %v6135_v7, %v5826_v58  ;;  %v1993_v44 = vrot.slane %v6162_v0, %v5817_v22  ;;  %v4078_v63 = vcombine.low %v4070_v51, %v4077_v24 }
 0x27a   :  { %v2000_v36 = vrot.slane %v6162_v0, %v5820_v45  ;;  %v2007_v62 = vrot.slane %v6162_v0, %v5823_v33  ;;  %v3534_v10 = vcombine.low %v3526_v49, %v3533_v43  ;;  %v6206_v1 = vadd.f32 %v5814_v18, %v1367_v50 }
 0x27b   :  { %v1313_v5 = vpop.xlane.xlu1 %1312  ;;  %v1371_v39 = vpop.xlane.xlu0 %1370  ;;  %v2014_v14 = vrot.slane %v6162_v0, %v5826_v58  ;;  %4549 = vperm.xlu0 %5277, %v4078_v63   ;;  %v2021_v16 = vrot.slane %v6173_v4, %v5817_v22  ;;  %v4036_v23 = vrot.slane %v4028_v60, %v5834_v54  ;;  %v4043_v51 = vrot.slane %v4029_v28, %v5834_v54 }
 0x27c   :  { %4453 = vperm.xlu1 %5278, %v3534_v10   ;;  %v2028_v24 = vrot.slane %v6173_v4, %v5820_v45  ;;  %v3536_v50 = vcombine.low %v1895_v2, %v1902_v13  ;;  %v3543_v49 = vrot.slane %v3535_v40, %v5834_v54  ;;  %v1429_v43 = vadd.f32 %v5814_v18, %v1311_v20 }
 0x27d   :  { %v2035_v60 = vrot.slane %v6173_v4, %v5823_v33  ;;  %v3552_v28 = vcombine.low %v1909_v17, %v1916_v30  ;;  %v3553_v47 = vcombine.low %v1923_v19, %v1930_v38  ;;  %v4045_v2 = vcombine.low %v2721_v15, %v2728_v6 }
 0x27e   :  { %v2042_v40 = vrot.slane %v6173_v4, %v5826_v58  ;;  %v4044_v30 = vcombine.low %v4036_v23, %v4043_v51  ;;  %v3550_v63 = vrot.slane %v3536_v50, %v5834_v54  ;;  %v6250_v25 = vadd.f32 %v5814_v18, %v1369_v8 }
 0x27f   :  { %v1373_v13 = vpop.xlane.xlu1 %1372  ;;  %v1315_v20 = vpop.xlane.xlu0 %1314  ;;  %v2049_v19 = vrot.slane %v1429_v43, %v5817_v22  ;;  %v2056_v38 = vrot.slane %v1429_v43, %v5820_v45  ;;  %v2063_v15 = vrot.slane %v1429_v43, %v5823_v33  ;;  %v2070_v10 = vrot.slane %v1429_v43, %v5826_v58 }
 0x280   :  { %4543 = vperm.xlu1 %5278, %v4044_v30   ;;  %v3551_v6 = vcombine.low %v3543_v49, %v3550_v63  ;;  %v3560_v27 = vrot.slane %v3552_v28, %v5834_v54  ;;  %v3567_v17 = vrot.slane %v3553_v47, %v5834_v54  ;;  %v2840_v23 = vrot.slane %v6206_v1, %v5820_v45 }
 0x281   :  { %v4046_v8 = vcombine.low %v2735_v42, %v2742_v21  ;;  %v4053_v51 = vrot.slane %v4045_v2, %v5834_v54  ;;  %v6268_v50 = vadd.f32 %v5814_v18, %v1313_v5  ;;  %v2847_v43 = vrot.slane %v6206_v1, %v5823_v33 }
 0x282   :  { %4456 = vperm.xlu0 %5277, %v3551_v6   ;;  %v3568_v28 = vcombine.low %v3560_v27, %v3567_v17  ;;  %v1459_v47 = vadd.f32 %v5814_v18, %v1371_v39  ;;  %v3586_v46 = vcombine.low %v1965_v61, %v1972_v35  ;;  %v2854_v42 = vrot.slane %v6206_v1, %v5826_v58 }
 0x283   :  { %v1317_v49 = vpop.xlane.xlu1 %1316  ;;  %v2861_v21 = vrot.slane %v6250_v25, %v5817_v22  ;;  %v2868_v5 = vrot.slane %v6250_v25, %v5820_v45  ;;  %v4060_v27 = vrot.slane %v4046_v8, %v5834_v54  ;;  %v1375_v2 = vpop.xlane.xlu0 %1374  ;;  %v2882_v17 = vrot.slane %v6250_v25, %v5826_v58 }
 0x284   :  { %v6290_v30 = vcombine.low %v2049_v19, %v2056_v38  ;;  %v6292_v61 = vcombine.low %v2063_v15, %v2070_v10  ;;  %4459 = vperm.xlu1 %5278, %v3568_v28   ;;  %v2077_v63 = vrot.slane %v6268_v50, %v5817_v22  ;;  %v3587_v6 = vcombine.low %v1979_v34, %v1986_v37 }
 0x285   :  { %v4061_v35 = vcombine.low %v4053_v51, %v4060_v27  ;;  %v3594_v8 = vrot.slane %v3586_v46, %v5834_v54  ;;  %v2889_v19 = vrot.slane %v1459_v47, %v5817_v22  ;;  %v2896_v38 = vrot.slane %v1459_v47, %v5820_v45 }
 0x286   :  { %v4096_v15 = vcombine.low %v2805_v41, %v2812_v9  ;;  %v4097_v26 = vcombine.low %v2819_v11, %v2826_v3  ;;  %v2903_v34 = vrot.slane %v1459_v47, %v5823_v33  ;;  %v3601_v37 = vrot.slane %v3587_v6, %v5834_v54 }
 0x287   :  { %v1377_v39 = vpop.xlane.xlu1 %1376  ;;  %4546 = vperm.xlu0 %5277, %v4061_v35   ;;  %v1431_v10 = vadd.f32 %v5814_v18, %v1315_v20  ;;  %v3620_v51 = vcombine.low %v2021_v16, %v2028_v24  ;;  %v2910_v28 = vrot.slane %v1459_v47, %v5826_v58  ;;  %v6324_v9 = vadd.f32 %v5814_v18, %v1373_v13  ;;  %v1319_v16 = vpop.xlane.xlu0 %1318 }
 0x288   :  { %v4104_v46 = vrot.slane %v4096_v15, %v5834_v54  ;;  %v4111_v41 = vrot.slane %v4097_v26, %v5834_v54  ;;  %v2084_v7 = vrot.slane %v6268_v50, %v5820_v45  ;;  %v2091_v11 = vrot.slane %v6268_v50, %v5823_v33 }
 0x289   :  { %v2098_v3 = vrot.slane %v6268_v50, %v5826_v58  ;;  %v3602_v20 = vcombine.low %v3594_v8, %v3601_v37  ;;  %v6334_v47 = vcombine.low %v2889_v19, %v2896_v38  ;;  %v2105_v35 = vrot.slane %v1431_v10, %v5817_v22 }
 0x28a   :  { %v4112_v27 = vcombine.low %v4104_v46, %v4111_v41  ;;  %v2112_v13 = vrot.slane %v1431_v10, %v5820_v45  ;;  %v3621_v6 = vcombine.low %v2035_v60, %v2042_v40  ;;  %v3628_v15 = vrot.slane %v3620_v51, %v5834_v54 }
 0x28b   :  { %v6332_v24 = vpop.xlane.xlu1 %1320  ;;  %4465 = vperm.xlu1 %5278, %v3602_v20   ;;  %v3569_v50 = vcombine.low %v1937_v31, %v1944_v59  ;;  %v3570_v8 = vcombine.low %v1951_v55, %v1958_v56  ;;  %v6354_v19 = vcombine.low %v2903_v34, %v2910_v28  ;;  %v2917_v4 = vrot.slane %v6324_v9, %v5817_v22 }
 0x28c   :  { %4555 = vperm.xlu0 %5277, %v4112_v27   ;;  %v1432_v60 = vadd.f32 %v5814_v18, %v1317_v49  ;;  %v1461_v40 = vadd.f32 %v5814_v18, %v1375_v2  ;;  %v3635_v38 = vrot.slane %v3621_v6, %v5834_v54  ;;  %v3654_v26 = vcombine.low %v2077_v63, %v2084_v7  ;;  %v1379_v63 = vpop.xlane.xlu0 %1378 }
 0x28d   :  { %v3577_v31 = vrot.slane %v3569_v50, %v5834_v54  ;;  %v3584_v59 = vrot.slane %v3570_v8, %v5834_v54  ;;  %v2924_v57 = vrot.slane %v6324_v9, %v5820_v45  ;;  %v2931_v55 = vrot.slane %v6324_v9, %v5823_v33 }
 0x28e   :  { %v2938_v56 = vrot.slane %v6324_v9, %v5826_v58  ;;  %v2119_v49 = vrot.slane %v1431_v10, %v5823_v33  ;;  %v2126_v2 = vrot.slane %v1431_v10, %v5826_v58  ;;  %v6373_v34 = vcombine.low %v2105_v35, %v2112_v13 }
 0x28f   :  { %v6363_v37 = vpop.xlane.xlu1 %1380  ;;  %v3636_v51 = vcombine.low %v3628_v15, %v3635_v38  ;;  %v3585_v28 = vcombine.low %v3577_v31, %v3584_v59  ;;  %v2133_v46 = vrot.slane %v1432_v60, %v5817_v22  ;;  %v2140_v41 = vrot.slane %v1432_v60, %v5820_v45 }
 0x290   :  { %v2147_v7 = vrot.slane %v1432_v60, %v5823_v33  ;;  %v2154_v20 = vrot.slane %v1432_v60, %v5826_v58  ;;  %v2945_v27 = vrot.slane %v1461_v40, %v5817_v22  ;;  %v3655_v6 = vcombine.low %v2091_v11, %v2098_v3  ;;  %v1323_v31 = vpop.xlane.xlu0 %1322 }
 0x291   :  { %4471 = vperm.xlu1 %5278, %v3636_v51   ;;  %4462 = vperm.xlu0 %5277, %v3585_v28   ;;  %v3662_v10 = vrot.slane %v3654_v26, %v5834_v54  ;;  %v2952_v13 = vrot.slane %v1461_v40, %v5820_v45  ;;  %v4079_v15 = vcombine.low %v2777_v12, %v2784_v32 }
 0x292   :  { %v4080_v11 = vcombine.low %v2791_v48, %v2798_v52  ;;  %v1462_v3 = vadd.f32 %v5814_v18, %v1377_v39  ;;  %v6397_v50 = vcombine.low %v2119_v49, %v2126_v2  ;;  %v3669_v8 = vrot.slane %v3655_v6, %v5834_v54 }
 0x293   :  { %v6381_v35 = vpop.xlane.xlu1 %1324  ;;  %v3603_v12 = vcombine.low %v1993_v44, %v2000_v36  ;;  %v3604_v53 = vcombine.low %v2007_v62, %v2014_v14  ;;  %v2959_v32 = vrot.slane %v1461_v40, %v5823_v33  ;;  %v2966_v48 = vrot.slane %v1461_v40, %v5826_v58 }
 0x294   :  { %v4087_v52 = vrot.slane %v4079_v15, %v5834_v54  ;;  %v4094_v39 = vrot.slane %v4080_v11, %v5834_v54  ;;  %v3670_v60 = vcombine.low %v3662_v10, %v3669_v8  ;;  %v2973_v38 = vrot.slane %v1462_v3, %v5817_v22 }
 0x295   :  { %v2980_v44 = vrot.slane %v1462_v3, %v5820_v45  ;;  %v1433_v36 = vadd.f32 %v5814_v18, %v1319_v16  ;;  %v3688_v0 = vcombine.low %v2133_v46, %v2140_v41  ;;  %v3689_v62 = vcombine.low %v2147_v7, %v2154_v20 }
 0x296   :  { %v6421_v14 = vcombine.low %v2945_v27, %v2952_v13  ;;  %v4095_v26 = vcombine.low %v4087_v52, %v4094_v39  ;;  %4477 = vperm.xlu1 %5278, %v3670_v60   ;;  %v2987_v40 = vrot.slane %v1462_v3, %v5823_v33  ;;  %v2994_v49 = vrot.slane %v1462_v3, %v5826_v58 }
 0x297   :  { %v6419_v59 = vpop.xlane.xlu1 %1384  ;;  %v3611_v2 = vrot.slane %v3603_v12, %v5834_v54  ;;  %v3618_v51 = vrot.slane %v3604_v53, %v5834_v54  ;;  %v6427_v28 = vcombine.low %v2959_v32, %v2966_v48  ;;  %v4155_v16 = vrot.slane %v6334_v47, %v5834_v54  ;;  %v1383_v12 = vpop.xlane.xlu0 %1382 }
 0x298   :  { %4552 = vperm.xlu0 %5277, %v4095_v26   ;;  %v4162_v46 = vrot.slane %v6354_v19, %v5834_v54  ;;  %v1434_v41 = vadd.f32 %v5814_v18, %v6332_v24  ;;  %v6435_v7 = vcombine.low %v2973_v38, %v2980_v44  ;;  %v2161_v20 = vrot.slane %v1433_v36, %v5817_v22 }
 0x299   :  { %v1463_v27 = vadd.f32 %v5814_v18, %v1379_v63  ;;  %v6992_v6 = vrot.slane %v6206_v1, %v5817_v22  ;;  %v2168_v19 = vrot.slane %v1433_v36, %v5820_v45  ;;  %v2175_v13 = vrot.slane %v1433_v36, %v5823_v33 }
 0x29a   :  { %v3619_v24 = vcombine.low %v3611_v2, %v3618_v51  ;;  %v4163_v15 = vcombine.low %v4155_v16, %v4162_v46  ;;  %v6449_v11 = vcombine.low %v2987_v40, %v2994_v49  ;;  %v2182_v3 = vrot.slane %v1433_v36, %v5826_v58 }
 0x29b   :  { %v4113_v10 = vcombine.low %v6992_v6, %v2840_v23  ;;  %v6445_v47 = vpop.xlane.xlu1 %1328  ;;  %v2189_v63 = vrot.slane %v1434_v41, %v5817_v22  ;;  %v2196_v8 = vrot.slane %v1434_v41, %v5820_v45  ;;  %v2203_v23 = vrot.slane %v1434_v41, %v5823_v33 }
 0x29c   :  { %4468 = vperm.xlu0 %5277, %v3619_v24   ;;  %4564 = vperm.xlu1 %5278, %v4163_v15   ;;  %v2210_v53 = vrot.slane %v1434_v41, %v5826_v58  ;;  %v4114_v32 = vcombine.low %v2847_v43, %v2854_v42  ;;  %v6993_v48 = vlaneseq  ;;  %v3001_v39 = vrot.slane %v1463_v27, %v5817_v22 }
 0x29d   :  { %v3008_v60 = vrot.slane %v1463_v27, %v5820_v45  ;;  %v4121_v38 = vrot.slane %v4113_v10, %v5834_v54  ;;  %v3696_v44 = vrot.slane %v3688_v0, %v5834_v54  ;;  %v6471_v26 = vcombine.low %v2161_v20, %v2168_v19 }
 0x29e   :  { %v6463_v52 = vand.u32 127, %v6993_v48  ;;  %v4128_v40 = vrot.slane %v4114_v32, %v5834_v54  ;;  %v3703_v1 = vrot.slane %v3689_v62, %v5834_v54  ;;  %v1464_v43 = vadd.f32 %v5814_v18, %v6363_v37 }
 0x29f   :  { %v6469_v36 = vpop.xlane.xlu1 %1388  ;;  %v6477_v42 = vcombine.low %v2175_v13, %v2182_v3  ;;  %v1435_v49 = vadd.f32 %v5814_v18, %v1323_v31  ;;  %v4164_v0 = vcombine.low %v2917_v4, %v2924_v57  ;;  %v4165_v62 = vcombine.low %v2931_v55, %v2938_v56  ;;  %v1327_v57 = vpop.xlane.xlu0 %1326 }
 0x2a0   :  { %v3722_v2 = vcombine.low %v2189_v63, %v2196_v8  ;;  %v3015_v37 = vrot.slane %v1463_v27, %v5823_v33  ;;  %v4129_v51 = vcombine.low %v4121_v38, %v4128_v40  ;;  %v3704_v16 = vcombine.low %v3696_v44, %v3703_v1 }
 0x2a1   :  { %v3723_v31 = vcombine.low %v2203_v23, %v2210_v53  ;;  %v3022_v46 = vrot.slane %v1463_v27, %v5826_v58  ;;  %v6494_v41 = vcombine.low %v3001_v39, %v3008_v60  ;;  %v4189_v4 = vrot.slane %v6421_v14, %v5834_v54 }
 0x2a2   :  { %4558 = vperm.xlu0 %5277, %v4129_v51   ;;  %4483 = vperm.xlu1 %5278, %v3704_v16   ;;  %v3029_v9 = vrot.slane %v1464_v43, %v5817_v22  ;;  %v3036_v55 = vrot.slane %v1464_v43, %v5820_v45  ;;  %v3043_v56 = vrot.slane %v1464_v43, %v5823_v33  ;;  %v6504_v6 = vadd.s32 4294967288, %v6463_v52 }
 0x2a3   :  { %v6498_v20 = vpop.xlane.xlu1 %1332  ;;  %v3050_v27 = vrot.slane %v1464_v43, %v5826_v58  ;;  %v2217_v10 = vrot.slane %v1435_v49, %v5817_v22  ;;  %v4172_v14 = vrot.slane %v4164_v0, %v5834_v54  ;;  %v4179_v19 = vrot.slane %v4165_v62, %v5834_v54  ;;  %v1387_v40 = vpop.xlane.xlu0 %1386 }
 0x2a4   :  { %v2224_v13 = vrot.slane %v1435_v49, %v5820_v45  ;;  %v2231_v24 = vrot.slane %v1435_v49, %v5823_v33  ;;  %v4196_v15 = vrot.slane %v6427_v28, %v5834_v54  ;;  %v1436_v3 = vadd.f32 %v5814_v18, %v6381_v35 }
 0x2a5   :  { %v2238_v63 = vrot.slane %v1435_v49, %v5826_v58  ;;  %v4180_v8 = vcombine.low %v4172_v14, %v4179_v19  ;;  %v3645_v23 = vrot.slane %v6290_v30, %v5834_v54  ;;  %v3652_v53 = vrot.slane %v6292_v61, %v5834_v54 }
 0x2a6   :  { %v4216_v48 = vcombine.low %v3015_v37, %v3022_v46  ;;  %v6523_v39 = vcombine.low %v3029_v9, %v3036_v55  ;;  %v4197_v60 = vcombine.low %v4189_v4, %v4196_v15  ;;  %v3730_v28 = vrot.slane %v3722_v2, %v5834_v54 }
 0x2a7   :  { %v6521_v32 = vpop.xlane.xlu1 %1392  ;;  %4567 = vperm.xlu0 %5277, %v4180_v8   ;;  %v2245_v35 = vrot.slane %v1436_v3, %v5817_v22  ;;  %v2252_v38 = vrot.slane %v1436_v3, %v5820_v45  ;;  %v1465_v44 = vadd.f32 %v5814_v18, %v1383_v12  ;;  %v6530_v30 = vadd.s32 4294967272, %v6463_v52 }
 0x2a8   :  { %v6532_v61 = vcombine.low %v3043_v56, %v3050_v27  ;;  %4570 = vperm.xlu1 %5278, %v4197_v60   ;;  %v2259_v1 = vrot.slane %v1436_v3, %v5823_v33  ;;  %v2266_v43 = vrot.slane %v1436_v3, %v5826_v58  ;;  %v3737_v49 = vrot.slane %v3723_v31, %v5834_v54 }
 0x2a9   :  { %v6537_v0 = vcombine.low %v2217_v10, %v2224_v13  ;;  %v6539_v62 = vcombine.low %v2231_v24, %v2238_v63  ;;  %v3653_v2 = vcombine.low %v3645_v23, %v3652_v53  ;;  %v1466_v12 = vadd.f32 %v5814_v18, %v6419_v59  ;;  %v1331_v13 = vpop.xlane.xlu0 %1330 }
 0x2aa   :  { %v3738_v37 = vcombine.low %v3730_v28, %v3737_v49  ;;  %v1437_v51 = vadd.f32 %v5814_v18, %v1327_v57  ;;  %v4206_v16 = vrot.slane %v6435_v7, %v5834_v54  ;;  %v4213_v46 = vrot.slane %v6449_v11, %v5834_v54 }
 0x2ab   :  { %v3756_v4 = vcombine.low %v2245_v35, %v2252_v38  ;;  %v3057_v31 = vrot.slane %v1465_v44, %v5817_v22  ;;  %v3064_v9 = vrot.slane %v1465_v44, %v5820_v45  ;;  %v3071_v55 = vrot.slane %v1465_v44, %v5823_v33  ;;  %4474 = vperm.xlu0 %5277, %v3653_v2   ;;  %v6551_v56 = vpop.xlane.xlu1 %1336 }
 0x2ac   :  { %v3757_v59 = vcombine.low %v2259_v1, %v2266_v43  ;;  %v3078_v27 = vrot.slane %v1465_v44, %v5826_v58  ;;  %4489 = vperm.xlu1 %5278, %v3738_v37   ;;  %v3085_v57 = vrot.slane %v1466_v12, %v5817_v22  ;;  %v3092_v7 = vrot.slane %v1466_v12, %v5820_v45 }
 0x2ad   :  { %v3099_v11 = vrot.slane %v1466_v12, %v5823_v33  ;;  %v3106_v10 = vrot.slane %v1466_v12, %v5826_v58  ;;  %v4214_v14 = vcombine.low %v4206_v16, %v4213_v46  ;;  %v4223_v19 = vrot.slane %v6494_v41, %v5834_v54 }
 0x2ae   :  { %v2273_v24 = vrot.slane %v1437_v51, %v5817_v22  ;;  %v2280_v15 = vrot.slane %v1437_v51, %v5820_v45  ;;  %v4230_v3 = vrot.slane %v4216_v48, %v5834_v54  ;;  %v1438_v63 = vadd.f32 %v5814_v18, %v6445_v47 }
 0x2af   :  { %v2287_v8 = vrot.slane %v1437_v51, %v5823_v33  ;;  %v2294_v23 = vrot.slane %v1437_v51, %v5826_v58  ;;  %4573 = vperm.xlu0 %5277, %v4214_v14   ;;  %v3679_v53 = vrot.slane %v6373_v34, %v5834_v54  ;;  %v3686_v41 = vrot.slane %v6397_v50, %v5834_v54  ;;  %v6577_v43 = vpop.xlane.xlu1 %1396 }
 0x2b0   :  { %v4249_v60 = vcombine.low %v3057_v31, %v3064_v9  ;;  %v4250_v28 = vcombine.low %v3071_v55, %v3078_v27  ;;  %v4231_v35 = vcombine.low %v4223_v19, %v4230_v3  ;;  %v3764_v38 = vrot.slane %v3756_v4, %v5834_v54 }
 0x2b1   :  { %v6572_v48 = vcombine.low %v3085_v57, %v3092_v7  ;;  %v2301_v47 = vrot.slane %v1438_v63, %v5817_v22  ;;  %v2308_v44 = vrot.slane %v1438_v63, %v5820_v45  ;;  %v1467_v1 = vadd.f32 %v5814_v18, %v1387_v40  ;;  %v1391_v40 = vpop.xlane.xlu0 %1390 }
 0x2b2   :  { %4576 = vperm.xlu1 %5278, %v4231_v35   ;;  %v2315_v34 = vrot.slane %v1438_v63, %v5823_v33  ;;  %v2322_v50 = vrot.slane %v1438_v63, %v5826_v58  ;;  %v3687_v49 = vcombine.low %v3679_v53, %v3686_v41  ;;  %v3771_v2 = vrot.slane %v3757_v59, %v5834_v54 }
 0x2b3   :  { %v6582_v12 = vcombine.low %v3099_v11, %v3106_v10  ;;  %v6584_v37 = vcombine.low %v2273_v24, %v2280_v15  ;;  %v6586_v51 = vcombine.low %v2287_v8, %v2294_v23  ;;  %v1468_v16 = vadd.f32 %v5814_v18, %v6469_v36 }
 0x2b4   :  { %4480 = vperm.xlu0 %5277, %v3687_v49   ;;  %v3772_v46 = vcombine.low %v3764_v38, %v3771_v2  ;;  %v1439_v4 = vadd.f32 %v5814_v18, %v1331_v13  ;;  %v4240_v31 = vrot.slane %v6523_v39, %v5834_v54  ;;  %v4247_v9 = vrot.slane %v6532_v61, %v5834_v54  ;;  %v6604_v13 = vpop.xlane.xlu1 %1400 }
 0x2b5   :  { %v3790_v55 = vcombine.low %v2301_v47, %v2308_v44  ;;  %v3113_v59 = vrot.slane %v1467_v1, %v5817_v22  ;;  %v3120_v27 = vrot.slane %v1467_v1, %v5820_v45  ;;  %v3127_v57 = vrot.slane %v1467_v1, %v5823_v33 }
 0x2b6   :  { %v3791_v7 = vcombine.low %v2315_v34, %v2322_v50  ;;  %v3134_v36 = vrot.slane %v1467_v1, %v5826_v58  ;;  %4495 = vperm.xlu1 %5278, %v3772_v46   ;;  %v3141_v11 = vrot.slane %v1468_v16, %v5817_v22  ;;  %v3148_v10 = vrot.slane %v1468_v16, %v5820_v45 }
 0x2b7   :  { %v3155_v39 = vrot.slane %v1468_v16, %v5823_v33  ;;  %v3162_v14 = vrot.slane %v1468_v16, %v5826_v58  ;;  %v4248_v61 = vcombine.low %v4240_v31, %v4247_v9  ;;  %v4257_v19 = vrot.slane %v4249_v60, %v5834_v54  ;;  %v1335_v60 = vpop.xlane.xlu0 %1334 }
 0x2b8   :  { %v2329_v24 = vrot.slane %v1439_v4, %v5817_v22  ;;  %v2336_v15 = vrot.slane %v1439_v4, %v5820_v45  ;;  %v4264_v3 = vrot.slane %v4250_v28, %v5834_v54  ;;  %v1440_v63 = vadd.f32 %v5814_v18, %v6498_v20 }
 0x2b9   :  { %v2343_v8 = vrot.slane %v1439_v4, %v5823_v33  ;;  %v2350_v23 = vrot.slane %v1439_v4, %v5826_v58  ;;  %4579 = vperm.xlu0 %5277, %v4248_v61   ;;  %v3713_v53 = vrot.slane %v6471_v26, %v5834_v54  ;;  %v3720_v41 = vrot.slane %v6477_v42, %v5834_v54 }
 0x2ba   :  { %v4283_v35 = vcombine.low %v3113_v59, %v3120_v27  ;;  %v4284_v38 = vcombine.low %v3127_v57, %v3134_v36  ;;  %v4265_v47 = vcombine.low %v4257_v19, %v4264_v3  ;;  %v3798_v28 = vrot.slane %v3790_v55, %v5834_v54 }
 0x2bb   :  { %v6618_v44 = vcombine.low %v3141_v11, %v3148_v10  ;;  %v2357_v20 = vrot.slane %v1440_v63, %v5817_v22  ;;  %v2364_v1 = vrot.slane %v1440_v63, %v5820_v45  ;;  %v1469_v34 = vadd.f32 %v5814_v18, %v1391_v40  ;;  %v1395_v11 = vpop.xlane.xlu0 %1394 }
 0x2bc   :  { %v6623_v50 = vpop.permute.xlu1 %4423  ;;  %4582 = vperm.xlu1 %5278, %v4265_v47   ;;  %v2371_v26 = vrot.slane %v1440_v63, %v5823_v33  ;;  %v2378_v42 = vrot.slane %v1440_v63, %v5826_v58  ;;  %v3721_v49 = vcombine.low %v3713_v53, %v3720_v41  ;;  %v3805_v2 = vrot.slane %v3791_v7, %v5834_v54 }
 0x2bd   :  { %v6628_v16 = vcombine.low %v3155_v39, %v3162_v14  ;;  %v6630_v46 = vcombine.low %v2329_v24, %v2336_v15  ;;  %v6632_v4 = vcombine.low %v2343_v8, %v2350_v23  ;;  %v1470_v31 = vadd.f32 %v5814_v18, %v6521_v32 }
 0x2be   :  { %4486 = vperm.xlu0 %5277, %v3721_v49   ;;  %v3806_v40 = vcombine.low %v3798_v28, %v3805_v2  ;;  %v1441_v9 = vadd.f32 %v5814_v18, %v1335_v60  ;;  %v4274_v55 = vrot.slane %v6572_v48, %v5834_v54  ;;  %v4281_v59 = vrot.slane %v6582_v12, %v5834_v54 }
 0x2bf   :  { %v3824_v27 = vcombine.low %v2357_v20, %v2364_v1  ;;  %v3169_v57 = vrot.slane %v1469_v34, %v5817_v22  ;;  %v3176_v7 = vrot.slane %v1469_v34, %v5820_v45  ;;  %v3183_v36 = vrot.slane %v1469_v34, %v5823_v33 }
 0x2c0   :  { %v6644_v10 = vpop.permute.xlu1 %4420  ;;  %v3825_v32 = vcombine.low %v2371_v26, %v2378_v42  ;;  %v3190_v39 = vrot.slane %v1469_v34, %v5826_v58  ;;  %4501 = vperm.xlu1 %5278, %v3806_v40   ;;  %v3197_v14 = vrot.slane %v1470_v31, %v5817_v22  ;;  %v3204_v48 = vrot.slane %v1470_v31, %v5820_v45 }
 0x2c1   :  { %v3211_v12 = vrot.slane %v1470_v31, %v5823_v33  ;;  %v3218_v61 = vrot.slane %v1470_v31, %v5826_v58  ;;  %v4282_v19 = vcombine.low %v4274_v55, %v4281_v59  ;;  %v4291_v24 = vrot.slane %v4283_v35, %v5834_v54 }
 0x2c2   :  { %v2385_v15 = vrot.slane %v1441_v9, %v5817_v22  ;;  %v2392_v3 = vrot.slane %v1441_v9, %v5820_v45  ;;  %v4298_v63 = vrot.slane %v4284_v38, %v5834_v54  ;;  %v1442_v8 = vadd.f32 %v5814_v18, %v6551_v56 }
 0x2c3   :  { %v2399_v23 = vrot.slane %v1441_v9, %v5823_v33  ;;  %v2406_v53 = vrot.slane %v1441_v9, %v5826_v58  ;;  %4585 = vperm.xlu0 %5277, %v4282_v19   ;;  %v3747_v41 = vrot.slane %v6537_v0, %v5834_v54  ;;  %v3754_v60 = vrot.slane %v6539_v62, %v5834_v54  ;;  %v1399_v0 = vpop.xlane.xlu0 %1398 }
 0x2c4   :  { %v6663_v35 = vpop.permute.xlu1 %4429  ;;  %v6665_v47 = vcombine.low %v3169_v57, %v3176_v7  ;;  %v6667_v28 = vcombine.low %v3183_v36, %v3190_v39  ;;  %v4299_v38 = vcombine.low %v4291_v24, %v4298_v63  ;;  %v3832_v56 = vrot.slane %v3824_v27, %v5834_v54 }
 0x2c5   :  { %v4334_v20 = vcombine.low %v3197_v14, %v3204_v48  ;;  %v2413_v1 = vrot.slane %v1442_v8, %v5817_v22  ;;  %v2420_v34 = vrot.slane %v1442_v8, %v5820_v45  ;;  %v1471_v26 = vadd.f32 %v5814_v18, %v1395_v11 }
 0x2c6   :  { %4588 = vperm.xlu1 %5278, %v4299_v38   ;;  %v2427_v62 = vrot.slane %v1442_v8, %v5823_v33  ;;  %v2434_v42 = vrot.slane %v1442_v8, %v5826_v58  ;;  %v3755_v49 = vcombine.low %v3747_v41, %v3754_v60  ;;  %v3839_v2 = vrot.slane %v3825_v32, %v5834_v54 }
 0x2c7   :  { %v4335_v31 = vcombine.low %v3211_v12, %v3218_v61  ;;  %v6676_v40 = vcombine.low %v2385_v15, %v2392_v3  ;;  %v6678_v9 = vcombine.low %v2399_v23, %v2406_v53  ;;  %v1472_v55 = vadd.f32 %v5814_v18, %v6577_v43 }
 0x2c8   :  { %v6682_v59 = vpop.permute.xlu1 %4519  ;;  %4492 = vperm.xlu0 %5277, %v3755_v49   ;;  %v3840_v27 = vcombine.low %v3832_v56, %v3839_v2  ;;  %v1473_v57 = vadd.f32 %v5814_v18, %v1399_v0  ;;  %v4308_v7 = vrot.slane %v6618_v44, %v5834_v54  ;;  %v4315_v36 = vrot.slane %v6628_v16, %v5834_v54 }
 0x2c9   :  { %v6689_v11 = vcombine.low %v2413_v1, %v2420_v34  ;;  %v3225_v32 = vrot.slane %v1471_v26, %v5817_v22  ;;  %v3232_v39 = vrot.slane %v1471_v26, %v5820_v45  ;;  %v3239_v43 = vrot.slane %v1471_v26, %v5823_v33 }
 0x2ca   :  { %v3859_v14 = vcombine.low %v2427_v62, %v2434_v42  ;;  %v3246_v48 = vrot.slane %v1471_v26, %v5826_v58  ;;  %4507 = vperm.xlu1 %5278, %v3840_v27   ;;  %v3253_v12 = vrot.slane %v1472_v55, %v5817_v22  ;;  %v3260_v61 = vrot.slane %v1472_v55, %v5820_v45 }
 0x2cb   :  { %v3267_v44 = vrot.slane %v1472_v55, %v5823_v33  ;;  %v3274_v16 = vrot.slane %v1472_v55, %v5826_v58  ;;  %v4316_v19 = vcombine.low %v4308_v7, %v4315_v36  ;;  %v4342_v24 = vrot.slane %v4334_v20, %v5834_v54 }
 0x2cc   :  { %v6700_v15 = vpop.permute.xlu1 %4426  ;;  %v3281_v3 = vrot.slane %v1473_v57, %v5817_v22  ;;  %v3288_v63 = vrot.slane %v1473_v57, %v5820_v45  ;;  %v3295_v8 = vrot.slane %v1473_v57, %v5823_v33  ;;  %v4349_v23 = vrot.slane %v4335_v31, %v5834_v54 }
 0x2cd   :  { %v3302_v53 = vrot.slane %v1473_v57, %v5826_v58  ;;  %4591 = vperm.xlu0 %5277, %v4316_v19   ;;  %v1474_v41 = vadd.f32 %v5814_v18, %v6604_v13  ;;  %v3781_v60 = vrot.slane %v6584_v37, %v5834_v54  ;;  %v3788_v38 = vrot.slane %v6586_v51, %v5834_v54  ;;  %v4517_v37 = vpop.permute.xlu0 %4516 }
 0x2ce   :  { %v6713_v56 = vcombine.low %v3225_v32, %v3232_v39  ;;  %v4350_v20 = vcombine.low %v4342_v24, %v4349_v23  ;;  %v4325_v1 = vrot.slane %v6665_v47, %v5834_v54  ;;  %v4332_v34 = vrot.slane %v6667_v28, %v5834_v54 }
 0x2cf   :  { %v6719_v26 = vcombine.low %v3239_v43, %v3246_v48  ;;  %v4368_v0 = vcombine.low %v3253_v12, %v3260_v61  ;;  %v3789_v62 = vcombine.low %v3781_v60, %v3788_v38  ;;  %v6723_v18 = vsub.s32 %v6504_v6, %v5412_v29 }
 0x2d0   :  { %v4369_v13 = vcombine.low %v3267_v44, %v3274_v16  ;;  %v6725_v51 = vcombine.low %v3281_v3, %v3288_v63  ;;  %4597 = vperm.xlu1 %5278, %v4350_v20   ;;  %v3815_v42 = vrot.slane %v6630_v46, %v5834_v54  ;;  %v3822_v47 = vrot.slane %v6632_v4, %v5834_v54 }
 0x2d1   :  { %v6731_v28 = vcombine.low %v3295_v8, %v3302_v53  ;;  %v3309_v49 = vrot.slane %v1474_v41, %v5817_v22  ;;  %v3316_v2 = vrot.slane %v1474_v41, %v5820_v45  ;;  %4498 = vperm.xlu0 %5277, %v3789_v62   ;;  %v6737_v6 = vsub.s32 %v6463_v52, %v5412_v29  ;;  %v4523_v39 = vpop.permute.xlu0 %4522 }
 0x2d2   :  { %v6739_v31 = vpop.permute.xlu1 %4435  ;;  %v4333_v55 = vcombine.low %v4325_v1, %v4332_v34  ;;  %v4621_v46 = vrot.slane %v6623_v50, %v6723_v18  ;;  %v3866_v4 = vrot.slane %v6689_v11, %v5834_v54  ;;  %v3873_v27 = vrot.slane %v3859_v14, %v5834_v54 }
 0x2d3   :  { %v3823_v57 = vcombine.low %v3815_v42, %v3822_v47  ;;  %v4616_v7 = vrot.slane %v6644_v10, %v6737_v6  ;;  %v3849_v36 = vrot.slane %v6676_v40, %v5834_v54  ;;  %v3856_v32 = vrot.slane %v6678_v9, %v5834_v54 }
 0x2d4   :  { %v3323_v43 = vrot.slane %v1474_v41, %v5823_v33  ;;  %v3330_v50 = vrot.slane %v1474_v41, %v5826_v58  ;;  %4594 = vperm.xlu1 %5278, %v4333_v55   ;;  %v4130_v11 = vcombine.low %v2861_v21, %v2868_v5  ;;  %v6994_v10 = vrot.slane %v6250_v25, %v5823_v33 }
 0x2d5   :  { %4504 = vperm.xlu0 %5277, %v3823_v57   ;;  %v4623_v9 = vsel %vm4622_vm1, %v4621_v46, %v4616_v7  ;;  %v4376_v14 = vrot.slane %v4368_v0, %v5834_v54  ;;  %v4383_v48 = vrot.slane %v4369_v13, %v5834_v54  ;;  %v6771_v45 = vsub.s32 %v6530_v30, %v5412_v29 }
 0x2d6   :  { %v4131_v40 = vcombine.low %v6994_v10, %v2882_v17  ;;  %v4526_v22 = vpop.permute.xlu1 %4525  ;;  %v4402_v21 = vcombine.low %v3309_v49, %v3316_v2  ;;  %v3874_v5 = vcombine.low %v3866_v4, %v3873_v27  ;;  %v4804_v58 = vrot.slane %v4517_v37, %v6737_v6 }
 0x2d7   :  { %v4808_v33 = vrot.slane %v6682_v59, %v6723_v18  ;;  %v3857_v25 = vcombine.low %v3849_v36, %v3856_v32  ;;  %v4138_v17 = vrot.slane %v4130_v11, %v5834_v54  ;;  %v4624_v61 = vadd.s32 4294967280, %v6463_v52  ;;  %v4529_v44 = vpop.permute.xlu0 %4528 }
 0x2d8   :  { %v4145_v12 = vrot.slane %v4131_v40, %v5834_v54  ;;  %v4403_v16 = vcombine.low %v3323_v43, %v3330_v50  ;;  %4513 = vperm.xlu1 %5278, %v3874_v5   ;;  %v4359_v30 = vrot.slane %v6713_v56, %v5834_v54  ;;  %v4366_v19 = vrot.slane %v6719_v26, %v5834_v54 }
 0x2d9   :  { %v4809_v24 = vsel %vm4622_vm1, %v4808_v33, %v4804_v58  ;;  %v4384_v3 = vcombine.low %v4376_v14, %v4383_v48  ;;  %4510 = vperm.xlu0 %5277, %v3857_v25   ;;  %v4635_v59 = vrot.slane %v6663_v35, %v6771_v45  ;;  %v6787_v63 = vsub.s32 %v4624_v61, %v5412_v29 }
 0x2da   :  { %v4645_v8 = vadd.s32 4294967256, %v6463_v52  ;;  %v4393_v23 = vrot.slane %v6725_v51, %v5834_v54  ;;  %v4818_v53 = vrot.slane %v4526_v22, %v6771_v45  ;;  %v4638_v41 = vadd.s32 4294967264, %v6463_v52  ;;  %v4433_v60 = vpop.permute.xlu1 %4432 }
 0x2db   :  { %v4146_v38 = vcombine.low %v4138_v17, %v4145_v12  ;;  %v4628_v56 = vrot.slane %v6700_v15, %v6787_v63  ;;  %v4813_v35 = vrot.slane %v4523_v39, %v6787_v63  ;;  %v4367_v20 = vcombine.low %v4359_v30, %v4366_v19  ;;  %v4445_v15 = vpop.permute.xlu0 %4444 }
 0x2dc   :  { %4603 = vperm.xlu1 %5278, %v4384_v3   ;;  %v4400_v1 = vrot.slane %v6731_v28, %v5834_v54  ;;  %v6800_v34 = vsub.s32 %v4645_v8, %v5412_v29  ;;  %v6803_v26 = vsub.s32 %v4638_v41, %v5412_v29  ;;  %v4652_v37 = vadd.s32 4294967248, %v6463_v52 }
 0x2dd   :  { %4561 = vperm.xlu0 %5277, %v4146_v38   ;;  %v4630_v0 = vsel %vm4629_vm2, %v4628_v56, %v4623_v9  ;;  %v4814_v62 = vsel %vm4629_vm2, %v4813_v35, %v4809_v24  ;;  %v4410_v46 = vrot.slane %v4402_v21, %v5834_v54  ;;  %v4417_v27 = vrot.slane %v4403_v16, %v5834_v54 }
 0x2de   :  { %v4819_v13 = vsel %vm4636_vm3, %v4818_v53, %v4814_v62  ;;  %v4823_v51 = vrot.slane %v4529_v44, %v6803_v26  ;;  %v4637_v42 = vsel %vm4636_vm3, %v4635_v59, %v4630_v0  ;;  %v4642_v47 = vrot.slane %v4433_v60, %v6803_v26 }
 0x2df   :  { %v4442_v28 = vpop.permute.xlu1 %4441  ;;  %v4649_v49 = vrot.slane %v6739_v31, %v6800_v34  ;;  %v4401_v4 = vcombine.low %v4393_v23, %v4400_v1  ;;  %v6819_v57 = vsub.s32 %v4652_v37, %v5412_v29  ;;  %v4659_v36 = vadd.s32 4294967240, %v6463_v52 }
 0x2e0   :  { %4600 = vperm.xlu1 %5278, %v4367_v20   ;;  %v4824_v2 = vsel %vm4643_vm4, %v4823_v51, %v4819_v13  ;;  %v4644_v55 = vsel %vm4643_vm4, %v4642_v47, %v4637_v42  ;;  %v4535_v32 = vpop.permute.xlu0 %4534  ;;  %v4666_v31 = vadd.s32 4294967232, %v6463_v52  ;;  %v4418_v50 = vcombine.low %v4410_v46, %v4417_v27 }
 0x2e1   :  { %v4651_v7 = vsel %vm4650_vm5, %v4649_v49, %v4644_v55  ;;  %v4833_v11 = vrot.slane %v4535_v32, %v6819_v57  ;;  %v6827_v54 = vsub.s32 %v4659_v36, %v5412_v29  ;;  %v4673_v40 = vadd.s32 4294967224, %v6463_v52 }
 0x2e2   :  { %v6832_v9 = vsub.s32 %v4666_v31, %v5412_v29  ;;  %v4680_v14 = vadd.s32 4294967216, %v6463_v52  ;;  %v4687_v24 = vadd.s32 4294967208, %v6463_v52  ;;  %v4694_v56 = vadd.s32 4294967200, %v6463_v52 }
 0x2e3   :  { %v4663_v5 = vrot.slane %v4442_v28, %v6827_v54  ;;  %v6839_v58 = vsub.s32 %v4673_v40, %v5412_v29  ;;  %v4701_v62 = vadd.s32 4294967192, %v6463_v52  ;;  %v4708_v31 = vadd.s32 4294967184, %v6463_v52 }
 0x2e4   :  { %4606 = vperm.xlu1 %5278, %v4401_v4   ;;  %v4532_v39 = vpop.permute.xlu1 %4531  ;;  %v4670_v33 = vrot.slane %v4445_v15, %v6832_v9  ;;  %v6843_v25 = vsub.s32 %v4680_v14, %v5412_v29  ;;  %v6855_v41 = vsub.s32 %v4687_v24, %v5412_v29  ;;  %v6865_v37 = vsub.s32 %v4694_v56, %v5412_v29 }
 0x2e5   :  { %v4828_v43 = vrot.slane %v4532_v39, %v6800_v34  ;;  %v4451_v17 = vpop.permute.xlu0 %4450  ;;  %v6869_v42 = vsub.s32 %v4701_v62, %v5412_v29  ;;  %v4715_v39 = vadd.s32 4294967176, %v6463_v52 }
 0x2e6   :  { %v4684_v19 = vrot.slane %v4451_v17, %v6843_v25 }
 0x2e7   :  { %v4829_v10 = vsel %vm4650_vm5, %v4828_v43, %v4824_v2  ;;  %v6886_v40 = vsub.s32 %v4715_v39, %v5412_v29 }
 0x2e8   :  { %4609 = vperm.xlu1 %5278, %v4418_v50   ;;  %v4834_v48 = vsel %vm4657_vm6, %v4833_v11, %v4829_v10  ;;  %v6883_v10 = vsub.s32 %v4708_v31, %v5412_v29 }
 0x2e9   :  { %v4439_v22 = vpop.permute.xlu1 %4438 }
 0x2ea   :  { %v4656_v21 = vrot.slane %v4439_v22, %v6819_v57  ;;  %v4541_v59 = vpop.permute.xlu0 %4540 }
 0x2eb   :  { %v4843_v60 = vrot.slane %v4541_v59, %v6832_v9 }
 0x2ec   :  { %v4658_v12 = vsel %vm4657_vm6, %v4656_v21, %v4651_v7 }
 0x2ed   :  { %v4665_v61 = vsel %vm4664_vm7, %v4663_v5, %v4658_v12 }
 0x2ee   :  { %v4448_v44 = vpop.permute.xlu1 %4447  ;;  %v4672_v16 = vsel %vm4671_vm8, %v4670_v33, %v4665_v61 }
 0x2ef   :  { %v4677_v30 = vrot.slane %v4448_v44, %v6839_v58 }
 0x2f1   :  { %v4679_v3 = vsel %vm4678_vm9, %v4677_v30, %v4672_v16 }
 0x2f2   :  { %v4686_v8 = vsel %vm4685_vm10, %v4684_v19, %v4679_v3 }
 0x2f3   :  { %v4538_v23 = vpop.permute.xlu1 %4537 }
 0x2f4   :  { %v4838_v53 = vrot.slane %v4538_v23, %v6827_v54 }
 0x2f6   :  { %v4839_v38 = vsel %vm4664_vm7, %v4838_v53, %v4834_v48  ;;  %v4550_v20 = vpop.permute.xlu0 %4549 }
 0x2f7   :  { %v4454_v35 = vpop.permute.xlu1 %4453  ;;  %v4844_v1 = vsel %vm4671_vm8, %v4843_v60, %v4839_v38  ;;  %v4858_v36 = vrot.slane %v4550_v20, %v6855_v41 }
 0x2f8   :  { %v4691_v0 = vrot.slane %v4454_v35, %v6855_v41 }
 0x2fa   :  { %v4693_v15 = vsel %vm4692_vm11, %v4691_v0, %v4686_v8 }
 0x2fb   :  { %v4544_v13 = vpop.permute.xlu1 %4543 }
 0x2fc   :  { %v4848_v51 = vrot.slane %v4544_v13, %v6839_v58 }
 0x2fd   :  { %v4457_v47 = vpop.permute.xlu0 %4456 }
 0x2fe   :  { %v4849_v28 = vsel %vm4678_vm9, %v4848_v51, %v4844_v1  ;;  %v4698_v49 = vrot.slane %v4457_v47, %v6865_v37 }
 0x2ff   :  { %v4460_v2 = vpop.permute.xlu1 %4459 }
 0x300   :  { %v4700_v55 = vsel %vm4699_vm12, %v4698_v49, %v4693_v15  ;;  %v4705_v46 = vrot.slane %v4460_v2, %v6869_v42 }
 0x302   :  { %v4707_v4 = vsel %vm4706_vm13, %v4705_v46, %v4700_v55  ;;  %v4547_v27 = vpop.permute.xlu0 %4546 }
 0x303   :  { %v4853_v7 = vrot.slane %v4547_v27, %v6843_v25 }
 0x305   :  { %v4854_v32 = vsel %vm4685_vm10, %v4853_v7, %v4849_v28 }
 0x306   :  { %v4466_v43 = vpop.permute.xlu1 %4465  ;;  %v4859_v50 = vsel %vm4692_vm11, %v4858_v36, %v4854_v32 }
 0x307   :  { %v4556_v11 = vpop.permute.xlu0 %4555  ;;  %v4719_v21 = vrot.slane %v4466_v43, %v6886_v40 }
 0x308   :  { %v4868_v29 = vrot.slane %v4556_v11, %v6869_v42 }
 0x30c   :  { %v4472_v14 = vpop.permute.xlu1 %4471  ;;  %v4463_v48 = vpop.permute.xlu0 %4462 }
 0x30d   :  { %v4712_v22 = vrot.slane %v4463_v48, %v6883_v10  ;;  %v4729_v49 = vrot.slane %v4472_v14, %v6723_v18 }
 0x30f   :  { %v4714_v52 = vsel %vm4713_vm14, %v4712_v22, %v4707_v4 }
 0x310   :  { %v6892_v5 = vsel %vm4720_vm15, %v4719_v21, %v4714_v52 }
 0x311   :  { %v4478_v33 = vpop.permute.xlu1 %4477 }
 0x312   :  { %v4739_v31 = vrot.slane %v4478_v33, %v6771_v45 }
 0x313   :  { %v4553_v17 = vpop.permute.xlu0 %4552 }
 0x314   :  { %v4863_v12 = vrot.slane %v4553_v17, %v6865_v37 }
 0x316   :  { %v4864_v61 = vsel %vm4699_vm12, %v4863_v12, %v4859_v50 }
 0x317   :  { %v4565_v44 = vpop.permute.xlu1 %4564  ;;  %v4469_v16 = vpop.permute.xlu0 %4468  ;;  %v6898_v30 = vsel %vm4706_vm13, %v4868_v29, %v4864_v61 }
 0x318   :  { %v4725_v47 = vrot.slane %v4469_v16, %v6737_v6  ;;  %v4883_v46 = vrot.slane %v4565_v44, %v6737_v6 }
 0x31a   :  { %v4730_v4 = vsel %vm4622_vm1, %v4729_v49, %v4725_v47 }
 0x31d   :  { %v4484_v19 = vpop.permute.xlu1 %4483  ;;  %v6900_v24 = vpop.permute.xlu0 %4558 }
 0x31e   :  { %v4749_v22 = vrot.slane %v4484_v19, %v6800_v34 }
 0x322   :  { %v4568_v3 = vpop.permute.xlu0 %4567 }
 0x323   :  { %v4571_v59 = vpop.permute.xlu1 %4570  ;;  %v4887_v2 = vrot.slane %v4568_v3, %v6723_v18 }
 0x324   :  { %v4892_v27 = vrot.slane %v4571_v59, %v6787_v63 }
 0x325   :  { %v4888_v39 = vsel %vm4622_vm1, %v4887_v2, %v4883_v46 }
 0x326   :  { %v4475_v8 = vpop.permute.xlu0 %4474  ;;  %v4893_v11 = vsel %vm4629_vm2, %v4892_v27, %v4888_v39 }
 0x327   :  { %v4490_v23 = vpop.permute.xlu1 %4489  ;;  %v4734_v28 = vrot.slane %v4475_v8, %v6787_v63 }
 0x328   :  { %v4759_v44 = vrot.slane %v4490_v23, %v6827_v54 }
 0x329   :  { %v4735_v7 = vsel %vm4629_vm2, %v4734_v28, %v4730_v4 }
 0x32a   :  { %v4574_v53 = vpop.permute.xlu0 %4573  ;;  %v4740_v18 = vsel %vm4636_vm3, %v4739_v31, %v4735_v7 }
 0x32b   :  { %v4897_v43 = vrot.slane %v4574_v53, %v6771_v45 }
 0x32d   :  { %v4577_v60 = vpop.permute.xlu1 %4576  ;;  %v4898_v21 = vsel %vm4636_vm3, %v4897_v43, %v4893_v11 }
 0x32e   :  { %v4902_v6 = vrot.slane %v4577_v60, %v6803_v26 }
 0x32f   :  { %v4481_v38 = vpop.permute.xlu0 %4480 }
 0x330   :  { %v4744_v36 = vrot.slane %v4481_v38, %v6803_v26  ;;  %v4903_v26 = vsel %vm4643_vm4, %v4902_v6, %v4898_v21 }
 0x331   :  { %v4496_v56 = vpop.permute.xlu1 %4495 }
 0x332   :  { %v4745_v63 = vsel %vm4643_vm4, %v4744_v36, %v4740_v18  ;;  %v4769_v23 = vrot.slane %v4496_v56, %v6839_v58 }
 0x333   :  { %v4750_v45 = vsel %vm4650_vm5, %v4749_v22, %v4745_v63 }
 0x334   :  { %v4580_v35 = vpop.permute.xlu0 %4579 }
 0x335   :  { %v4907_v52 = vrot.slane %v4580_v35, %v6800_v34  ;;  %v4873_v34 = vrot.slane %v6900_v24, %v6883_v10 }
 0x337   :  { %v4583_v20 = vpop.permute.xlu1 %4582  ;;  %v4908_v16 = vsel %vm4650_vm5, %v4907_v52, %v4903_v26 }
 0x338   :  { %v4912_v17 = vrot.slane %v4583_v20, %v6819_v57 }
 0x339   :  { %v4487_v1 = vpop.permute.xlu0 %4486 }
 0x33a   :  { %v4754_v14 = vrot.slane %v4487_v1, %v6819_v57  ;;  %v4913_v8 = vsel %vm4657_vm6, %v4912_v17, %v4908_v16 }
 0x33b   :  { %v6902_v0 = vpop.permute.xlu1 %4501 }
 0x33c   :  { %v4755_v12 = vsel %vm4657_vm6, %v4754_v14, %v4750_v45 }
 0x33d   :  { %v4760_v59 = vsel %vm4664_vm7, %v4759_v44, %v4755_v12 }
 0x33e   :  { %v4586_v62 = vpop.permute.xlu0 %4585 }
 0x33f   :  { %v4917_v19 = vrot.slane %v4586_v62, %v6827_v54 }
 0x341   :  { %v4589_v15 = vpop.permute.xlu1 %4588  ;;  %v4918_v35 = vsel %vm4664_vm7, %v4917_v19, %v4913_v8 }
 0x342   :  { %v4922_v57 = vrot.slane %v4589_v15, %v6832_v9 }
 0x343   :  { %v4493_v13 = vpop.permute.xlu0 %4492 }
 0x344   :  { %v4764_v29 = vrot.slane %v4493_v13, %v6832_v9  ;;  %v4874_v9 = vsel %vm4713_vm14, %v4873_v34, %v6898_v30  ;;  %v4923_v15 = vsel %vm4671_vm8, %v4922_v57, %v4918_v35 }
 0x345   :  { %v6904_v51 = vpop.permute.xlu1 %4507 }
 0x346   :  { %v4765_v53 = vsel %vm4671_vm8, %v4764_v29, %v4760_v59 }
 0x347   :  { %v4770_v62 = vsel %vm4678_vm9, %v4769_v23, %v4765_v53 }
 0x348   :  { %v4592_v55 = vpop.permute.xlu0 %4591 }
 0x349   :  { %v4927_v54 = vrot.slane %v4592_v55, %v6839_v58 }
 0x34b   :  { %v4598_v32 = vpop.permute.xlu1 %4597  ;;  %v4928_v28 = vsel %vm4678_vm9, %v4927_v54, %v4923_v15 }
 0x34c   :  { %v4499_v50 = vpop.permute.xlu0 %4498  ;;  %v4937_v55 = vrot.slane %v4598_v32, %v6855_v41 }
 0x34d   :  { %v4774_v60 = vrot.slane %v4499_v50, %v6843_v25 }
 0x34f   :  { %v4595_v48 = vpop.permute.xlu1 %4594  ;;  %v4775_v13 = vsel %vm4685_vm10, %v4774_v60, %v4770_v62 }
 0x350   :  { %v4505_v33 = vpop.permute.xlu0 %4504  ;;  %v4932_v24 = vrot.slane %v4595_v48, %v6843_v25  ;;  %v4779_v25 = vrot.slane %v6902_v0, %v6855_v41  ;;  %v4789_v0 = vrot.slane %v6904_v51, %v6869_v42 }
 0x351   :  { %v4784_v56 = vrot.slane %v4505_v33, %v6865_v37 }
 0x352   :  { %v4933_v30 = vsel %vm4685_vm10, %v4932_v24, %v4928_v28  ;;  %v4780_v46 = vsel %vm4692_vm11, %v4779_v25, %v4775_v13 }
 0x353   :  { %v4514_v61 = vpop.permute.xlu1 %4513  ;;  %v4785_v4 = vsel %vm4699_vm12, %v4784_v56, %v4780_v46  ;;  %v4938_v36 = vsel %vm4692_vm11, %v4937_v55, %v4933_v30 }
 0x354   :  { %v4511_v3 = vpop.permute.xlu0 %4510  ;;  %v4790_v41 = vsel %vm4706_vm13, %v4789_v0, %v4785_v4  ;;  %v4799_v43 = vrot.slane %v4514_v61, %v6886_v40 }
 0x355   :  { %v4794_v27 = vrot.slane %v4511_v3, %v6883_v10 }
 0x357   :  { %v4604_v38 = vpop.permute.xlu1 %4603  ;;  %v4795_v32 = vsel %vm4713_vm14, %v4794_v27, %v4790_v41 }
 0x358   :  { %v4562_v20 = vpop.permute.xlu0 %4561 }
 0x359   :  { %v4878_v1 = vrot.slane %v4562_v20, %v6886_v40 }
 0x35b   :  { %v4601_v47 = vpop.permute.xlu1 %4600  ;;  %v4879_v58 = vsel %vm4720_vm15, %v4878_v1, %v4874_v9 }
 0x35c   :  { %v4960_v49 = vsel %vm4959_vm0, %v4879_v58, %v6892_v5  ;;  %v4942_v2 = vrot.slane %v4601_v47, %v6865_v37  ;;  %v4947_v37 = vrot.slane %v4604_v38, %v6869_v42 }
 0x35e   :  { %v4943_v5 = vsel %vm4699_vm12, %v4942_v2, %v4938_v36 }
 0x35f   :  { %v4607_v7 = vpop.permute.xlu1 %4606  ;;  %v4948_v50 = vsel %vm4706_vm13, %v4947_v37, %v4943_v5 }
 0x360   :  { %v4952_v31 = vrot.slane %v4607_v7, %v6883_v10  ;;  %v4800_v10 = vsel %vm4720_vm15, %v4799_v43, %v4795_v32 }
 0x362   :  { %v4953_v51 = vsel %vm4713_vm14, %v4952_v31, %v4948_v50 }
 0x363   :  { %v4610_v39 = vpop.permute.xlu1 %4609 }
 0x364   :  { %v4957_v18 = vrot.slane %v4610_v39, %v6886_v40 }
 0x366   :  { %v4958_v6 = vsel %vm4720_vm15, %v4957_v18, %v4953_v51 }
 0x367   :  { %v4961_v42 = vsel %vm4959_vm0, %v4958_v6, %v4800_v10 }
 0x368   :  { %v4962_v11 = vcombine.low %v4960_v49, %v4961_v42 }
 0x36a   :  { %4999 = vst.sshfl [vmem:[#allocation6] sm:$0x33 pattern:$0x76325410] %v4962_v11 }
 0x36b   :  { %5310 = shalt.err (!%p5307_p9)
}
 0x36c   :  { %4981 = dma.vmem_to_hbm [thread:$0]  %s4979_s6, 64, %s6990_s8, [#allocation5]  }
 0x36d   :  { %5321 = dma.done.wait [#allocation5], 64  }
 0x36e   :  { %5322 = vsyncadd [#allocation5], 4294967232 }
 0x36f   :  { %4985 = vsyncpa [#allocation4], 1 }
 0x370   :  { %4986 = vsyncpa [#allocation5], 1 }

</bundles_post_ra>
